<compile_context>
chip_gen: v5e
topology: v5e:2x2
jax: 0.10.0
libtpu: 0.0.40
codegen_flags: <defaults>
</compile_context>

<pallas_src>
import functools

import numpy as np
import jax
import jax.numpy as jnp
from jax.experimental import pallas as pl
from jax.experimental.pallas import tpu as pltpu


# ------------------------------------------------------------------ host-side tables

def _make_rope_tables(n_ropes, d_head, rope_coef):
    """Faithful port of RoPEMaskedAttentionHead._get_rotary_vectors (including its quirks:
    theta uses (i-1), and sin[:, 2i+1] is written with cos(m_theta))."""
    sin = np.zeros((n_ropes, d_head), dtype=np.float32)
    cos = np.zeros((n_ropes, d_head), dtype=np.float32)
    for position in range(n_ropes):
        for i in range(d_head // 2):
            theta = 10000.0 ** (-2.0 * (i - 1) / d_head)
            m_theta = position * theta * rope_coef
            cos[position, 2 * i] = np.cos(m_theta)
            cos[position, 2 * i + 1] = np.cos(m_theta)
            sin[position, 2 * i] = -np.sin(m_theta)
            sin[position, 2 * i + 1] = np.cos(m_theta)  # (sic) source writes cos here
    return sin, cos


def _fold_rope_tables(sin, cos):
    """Fold the aliased in-place swap of the PyTorch source into the tables so the kernel only
    needs one lane roll:

        rope(z)[j] = z[j]*cos[j] + z_sw[j]*sin[j],  z_sw[j] = z[j+1] if j even else z[j]
                   = z[j]*cos_eff[j] + z[(j+1) % D]*sin_eff[j]

    with cos_eff = cos + sin*odd_mask and sin_eff = sin*even_mask (odd lanes of sin_eff are
    exactly 0, so the circular wrap of the roll and cross-head lanes never contribute)."""
    d = sin.shape[-1]
    even = (np.arange(d) % 2 == 0).astype(np.float32)
    odd = 1.0 - even
    cos_eff = cos + sin * odd
    sin_eff = sin * even
    return sin_eff.astype(np.float32), cos_eff.astype(np.float32)


def _pick_tile(n, target):
    """Largest divisor of n that is <= target (returns n itself when n <= target)."""
    if n <= target:
        return n
    for t in range(target, 0, -1):
        if n % t == 0:
            return t
    return n


# ------------------------------------------------------------------ Pallas kernel

def _llama_block_kernel(n_heads, d_head, tq, tk, ti,
                        x_ref, rms_w_ref,
                        wq_ref, bq_ref, wk_ref, bk_ref, wv_ref, bv_ref,
                        wo_ref, bo_ref,
                        cosq_ref, sinq_ref, cosk_ref, sink_ref,
                        w1_ref, b1_ref, w3_ref, b3_ref, w2_ref, b2_ref,
                        out_ref):
    x = x_ref[0]                      # (S, D) f32
    S, D = x.shape
    H, dh = n_heads, d_head
    bf16 = jnp.bfloat16
    # TODO(synk): RMSNorm / SwiGLU class definitions were not included in the source;
    #             standard per-token RMSNorm (eps=1e-8) and SwiGLU = silu(W1 x) * (W3 x) assumed.
    eps = jnp.float32(1e-8)
    rms_w = rms_w_ref[...]            # (1, D)

    def rmsnorm(v):
        ms = jnp.mean(v * v, axis=-1, keepdims=True)
        return v * jax.lax.rsqrt(ms + eps) * rms_w

    def rope(z, cos_eff, sin_eff):    # z: (S, D) f32
        # roll(D-1) == roll(-1): lane j picks up z[:, (j+1) % D]; odd lanes of sin_eff are 0,
        # so the wrap-around lane / cross-head lanes never contribute.
        z_nb = pltpu.roll(z, D - 1, axis=1)
        return z * cos_eff + z_nb * sin_eff

    # ---- attention branch ----
    t = rmsnorm(x)
    t_lo = t.astype(bf16)
    q = jnp.dot(t_lo, wq_ref[...], preferred_element_type=jnp.float32) + bq_ref[...]
    k = jnp.dot(t_lo, wk_ref[...], preferred_element_type=jnp.float32) + bk_ref[...]
    v = jnp.dot(t_lo, wv_ref[...], preferred_element_type=jnp.float32) + bv_ref[...]

    # 1/sqrt(d_head) softmax scale already folded into cos_q/sin_q host-side.
    qr = rope(q, cosq_ref[...], sinq_ref[...])
    kr = rope(k, cosk_ref[...], sink_ref[...])

    # TODO(synk): for production d_head >= 128, replace the lane-slice split / concat with
    #             pltpu.einshape('s(hd)->hsd', ...) so head slices are lane-aligned & free.
    def split_heads(z):               # (S, H*dh) -> (H, S, dh)
        return jnp.stack(
            [z[:, h * dh:(h + 1) * dh] for h in range(H)], axis=0)

    q3 = split_heads(qr).astype(bf16)
    k3 = split_heads(kr).astype(bf16)
    v3 = split_heads(v).astype(bf16)

    NEG = jnp.float32(-1e30)
    n_qt = S // tq
    n_kt = S // tk
    o_tiles = []
    for qi in range(n_qt):
        q_start = qi * tq
        q_tile = q3[:, q_start:q_start + tq, :]                  # (H, Tq, dh) bf16
        m = jnp.full((H, tq, 1), -jnp.inf, jnp.float32)
        l = jnp.zeros((H, tq, 1), jnp.float32)
        acc = jnp.zeros((H, tq, dh), jnp.float32)
        for ki in range(n_kt):
            k_start = ki * tk
            if k_start > q_start + tq - 1:
                continue                                         # fully-masked causal tile
            k_tile = k3[:, k_start:k_start + tk, :]
            v_tile = v3[:, k_start:k_start + tk, :]
            s = jnp.einsum('hqd,hkd->hqk', q_tile, k_tile,
                           preferred_element_type=jnp.float32)   # (H, Tq, Tk) f32
            if k_start + tk - 1 > q_start:                       # diagonal tile: mask needed
                row = jax.lax.broadcasted_iota(jnp.int32, (tq, tk), 0) + q_start
                col = jax.lax.broadcasted_iota(jnp.int32, (tq, tk), 1) + k_start
                s = jnp.where((row >= col)[None, :, :], s, NEG)
            m_new = jnp.maximum(m, jnp.max(s, axis=-1, keepdims=True))
            a = jnp.exp(m - m_new)
            p = jnp.exp(s - m_new)
            l = a * l + jnp.sum(p, axis=-1, keepdims=True)
            acc = a * acc + jnp.einsum('hqk,hkd->hqd', p.astype(bf16), v_tile,
                                       preferred_element_type=jnp.float32)
            m = m_new
        # normalize after PV (fewer elements, EUP reciprocal slot)
        o_tiles.append(acc * pl.reciprocal(l, approx=True))
    o = o_tiles[0] if n_qt == 1 else jnp.concatenate(o_tiles, axis=1)   # (H, S, dh) f32

    attn_cat = jnp.concatenate([o[h] for h in range(H)], axis=-1)       # (S, D)
    attn = jnp.dot(attn_cat.astype(bf16), wo_ref[...],
                   preferred_element_type=jnp.float32) + bo_ref[...]
    x1 = x + attn

    # ---- feedforward branch (SwiGLU -> Linear), I-tiled accumulation ----
    t2 = rmsnorm(x1)
    t2_lo = t2.astype(bf16)
    I = w1_ref.shape[1]
    n_it = I // ti
    ff = jnp.zeros((S, D), jnp.float32)
    for it in range(n_it):
        lo, hi = it * ti, (it + 1) * ti
        g = jnp.dot(t2_lo, w1_ref[:, lo:hi],
                    preferred_element_type=jnp.float32) + b1_ref[:, lo:hi]
        u = jnp.dot(t2_lo, w3_ref[:, lo:hi],
                    preferred_element_type=jnp.float32) + b3_ref[:, lo:hi]
        hidden = (g * jax.nn.sigmoid(g) * u).astype(bf16)        # (S, Ti)
        ff = ff + jnp.dot(hidden, w2_ref[lo:hi, :],
                          preferred_element_type=jnp.float32)
    ff = ff + b2_ref[...]

    out_ref[0] = x1 + ff


# ------------------------------------------------------------------ wrapper

PARAM_ORDER = ('rms_w', 'wq', 'bq', 'wk', 'bk', 'wv', 'bv',
               'wo', 'bo', 'cos_q', 'sin_q', 'cos_k', 'sin_k',
               'w1', 'b1', 'w3', 'b3', 'w2', 'b2')


def _build_pallas_call(x, ordered, n_heads, d_head, tq, tk, ti, single_buffer):
    B, S, D = x.shape
    I = ordered[PARAM_ORDER.index('w1')].shape[1]
    kernel = functools.partial(_llama_block_kernel, n_heads, d_head, tq, tk, ti)

    def const_spec(a):
        nd = a.ndim
        idx = lambda b, _nd=nd: (0,) * _nd
        if single_buffer:
            # constant index_map across the batch grid -> one resident copy is enough
            return pl.BlockSpec(a.shape, idx, pipeline_mode=pl.Buffered(1))
        return pl.BlockSpec(a.shape, idx)

    in_specs = ([pl.BlockSpec((1, S, D), lambda b: (b, 0, 0))]
                + [const_spec(a) for a in ordered])

    # ---- explicit VMEM limit: resident weights + tables + live intermediates, with headroom
    w_bytes = (4 * D * D + 3 * D * I) * 2                      # bf16 weights
    vec_bytes = (6 * D + 2 * I) * 4 + 4 * S * D * 4            # biases + rms_w + 4 rope tables
    io_bytes = 2 * (2 * S * D * 4)                             # double-buffered x / out blocks
    live_bytes = (12 * S * D + 4 * S * ti
                  + 4 * n_heads * tq * tk
                  + 3 * n_heads * S * d_head) * 4              # rough live f32 intermediates
    vmem_limit = int(1.5 * (w_bytes + vec_bytes + io_bytes + live_bytes))
    vmem_limit = max(vmem_limit, 32 * 1024 * 1024)
    vmem_limit = min(vmem_limit, 64 * 1024 * 1024)             # valid ceiling on v5e/v6e/v7x

    # ---- rough matmul flop / transcendental / byte counts for XLA's scheduler
    flops = int(B) * (8 * S * D * D + 2 * S * S * D + 6 * S * D * I)
    transcendentals = int(B) * (n_heads * S * S // 2 + S * I)
    bytes_accessed = (2 * B * S * D * 4 + w_bytes + vec_bytes)
    cost = pl.CostEstimate(flops=int(flops), transcendentals=int(transcendentals),
                           bytes_accessed=int(bytes_accessed))

    return pl.pallas_call(
        kernel,
        out_shape=jax.ShapeDtypeStruct((B, S, D), jnp.float32),
        grid_spec=pltpu.PrefetchScalarGridSpec(
            num_scalar_prefetch=0,
            grid=(B,),
            in_specs=in_specs,
            out_specs=pl.BlockSpec((1, S, D), lambda b: (b, 0, 0)),
        ),
        compiler_params=pltpu.CompilerParams(
            # batch items independent -> v7x can split the grid across its 2 TensorCores
            # (keep B >= 2, or add a parallel q-tile axis, so both cores get work)
            dimension_semantics=("parallel",),
            vmem_limit_bytes=vmem_limit,
        ),
        cost_estimate=cost,
    )


def llama_block_pallas(x, params, n_heads, d_head):
    ordered = [params[k] for k in PARAM_ORDER]
    S = x.shape[1]
    I = params['w1'].shape[1]
    tq = _pick_tile(S, 256)        # 256-multiples keep the v6e/v7x 256x256 MXU full
    tk = _pick_tile(S, 256)
    ti = _pick_tile(I, 512)

    last_err = None
    for single_buffer in (True, False):
        try:
            fn = _build_pallas_call(x, ordered, n_heads, d_head, tq, tk, ti, single_buffer)
            out = fn(x, *ordered)
            return jax.block_until_ready(out)
        except Exception as e:   # guard only: fall back if Buffered(1) is unsupported here
            last_err = e
            if not single_buffer:
                raise
    raise last_err  # unreachable


# ------------------------------------------------------------------ params + pure-JAX reference

def init_params(key, n_heads, d_model, inter_dim, n_ropes, rope_coef, seq_len):
    d_head = d_model // n_heads
    keys = jax.random.split(key, 8)

    def lin(k, fan_in, fan_out):
        kw, kb = jax.random.split(k)
        w = jax.random.normal(kw, (fan_in, fan_out), jnp.float32) * 0.05
        b = jax.random.normal(kb, (1, fan_out), jnp.float32) * 0.02
        return w.astype(jnp.bfloat16), b        # weights stored in bf16, biases in f32

    wq, bq = lin(keys[0], d_model, d_model)      # per-head W_q packed along columns
    wk, bk = lin(keys[1], d_model, d_model)
    wv, bv = lin(keys[2], d_model, d_model)
    wo, bo = lin(keys[3], d_model, d_model)      # output projection
    w1, b1 = lin(keys[4], d_model, inter_dim)    # SwiGLU gate
    w3, b3 = lin(keys[5], d_model, inter_dim)    # SwiGLU up
    w2, b2 = lin(keys[6], inter_dim, d_model)    # FFN out
    rms_w = (1.0 + 0.1 * jax.random.normal(keys[7], (1, d_model), jnp.float32))

    sin_np, cos_np = _make_rope_tables(n_ropes, d_head, rope_coef)
    sin_np, cos_np = sin_np[:seq_len], cos_np[:seq_len]
    sin_eff, cos_eff = _fold_rope_tables(sin_np, cos_np)

    scale = np.float32(1.0 / np.sqrt(d_head))
    cos_q = np.tile(cos_eff * scale, (1, n_heads)).astype(np.float32)   # scale folded (q side)
    sin_q = np.tile(sin_eff * scale, (1, n_heads)).astype(np.float32)
    cos_k = np.tile(cos_eff, (1, n_heads)).astype(np.float32)
    sin_k = np.tile(sin_eff, (1, n_heads)).astype(np.float32)
    # invariant required by the lane-roll RoPE: odd lanes of sin_* are exactly zero (f32 tables)
    assert np.all(sin_q[:, 1::2] == 0.0) and np.all(sin_k[:, 1::2] == 0.0)

    # raw tables for the pure-JAX reference
    cos_raw = jnp.asarray(np.tile(cos_np, (1, n_heads)))       # (S, D)
    sin_raw = jnp.asarray(np.tile(sin_np, (1, n_heads)))       # (S, D)

    return dict(rms_w=rms_w, wq=wq, bq=bq, wk=wk, bk=bk, wv=wv, bv=bv,
                wo=wo, bo=bo,
                cos_q=jnp.asarray(cos_q), sin_q=jnp.asarray(sin_q),
                cos_k=jnp.asarray(cos_k), sin_k=jnp.asarray(sin_k),
                cos_raw=cos_raw, sin_raw=sin_raw,
                w1=w1, b1=b1, w3=w3, b3=b3, w2=w2, b2=b2)


def llama_block_ref(x, p, n_heads, d_head):
    """Pure-JAX f32 reference mirroring the PyTorch forward (for validation)."""
    def rms(v):
        return v * jax.lax.rsqrt(jnp.mean(v * v, axis=-1, keepdims=True) + 1e-8) * p['rms_w'][0]

    cos, sin = p['cos_raw'], p['sin_raw']

    def rope(z):
        odd = z[..., 1::2]
        sw = jnp.repeat(odd, 2, axis=-1)          # both even & odd slots get the odd values
        return z * cos + sw * sin

    f32 = lambda a: a.astype(jnp.float32)
    t = rms(x)
    q = t @ f32(p['wq']) + p['bq'][0]
    k = t @ f32(p['wk']) + p['bk'][0]
    v = t @ f32(p['wv']) + p['bv'][0]
    qr, kr = rope(q), rope(k)

    B, S, D = x.shape
    mask = np.tril(np.ones((S, S), dtype=bool))
    scale = 1.0 / np.sqrt(d_head)
    heads = []
    for h in range(n_heads):
        sl = slice(h * d_head, (h + 1) * d_head)
        s = jnp.einsum('bqd,bkd->bqk', qr[..., sl], kr[..., sl]) * scale
        s = jnp.where(mask, s, -jnp.inf)
        pr = jax.nn.softmax(s, axis=-1)
        heads.append(jnp.einsum('bqk,bkd->bqd', pr, v[..., sl]))
    attn = jnp.concatenate(heads, axis=-1) @ f32(p['wo']) + p['bo'][0]
    x1 = x + attn

    t2 = rms(x1)
    g = t2 @ f32(p['w1']) + p['b1'][0]
    u = t2 @ f32(p['w3']) + p['b3'][0]
    ff = (g * jax.nn.sigmoid(g) * u) @ f32(p['w2']) + p['b2'][0]
    return x1 + ff


# ------------------------------------------------------------------ main

if __name__ == "__main__":
    # NOTE: validation shapes only.  D=32 (< 128 lanes) forces masked vst.msk output stores and
    # 8-lane head slices; benchmark with D, d_head multiples of 128 (and S >= 256) instead.
    B, S = 2, 8                       # B >= 2 so the "parallel" grid can use both v7x TCs
    n_heads, d_model, inter_dim = 4, 32, 64
    n_ropes, rope_coef = 16, 1.0
    d_head = d_model // n_heads

    key = jax.random.PRNGKey(0)
    kx, kp = jax.random.split(key)
    x = jax.random.normal(kx, (B, S, d_model), jnp.float32)
    params = init_params(kp, n_heads, d_model, inter_dim, n_ropes, rope_coef, S)

    out = llama_block_pallas(x, params, n_heads, d_head)
    out = jax.block_until_ready(out)

    ref = llama_block_ref(x, params, n_heads, d_head)
    # bf16 matmul inputs + approx reciprocal vs. the f32 reference -> relaxed tolerance
    np.testing.assert_allclose(np.asarray(out), np.asarray(ref), rtol=2e-2, atol=2e-2)

    print("KERNEL_OK")
</pallas_src>

<mosaic_0001>
module attributes {stable_mosaic.version = 11 : i64} {
  func.func @_llama_block_kernel(%arg0: i32, %arg1: memref<1x8x32xf32, #tpu.memory_space<vmem>>, %arg2: memref<1x32xf32, #tpu.memory_space<vmem>>, %arg3: memref<32x32xbf16, #tpu.memory_space<vmem>>, %arg4: memref<1x32xf32, #tpu.memory_space<vmem>>, %arg5: memref<32x32xbf16, #tpu.memory_space<vmem>>, %arg6: memref<1x32xf32, #tpu.memory_space<vmem>>, %arg7: memref<32x32xbf16, #tpu.memory_space<vmem>>, %arg8: memref<1x32xf32, #tpu.memory_space<vmem>>, %arg9: memref<32x32xbf16, #tpu.memory_space<vmem>>, %arg10: memref<1x32xf32, #tpu.memory_space<vmem>>, %arg11: memref<8x32xf32, #tpu.memory_space<vmem>>, %arg12: memref<8x32xf32, #tpu.memory_space<vmem>>, %arg13: memref<8x32xf32, #tpu.memory_space<vmem>>, %arg14: memref<8x32xf32, #tpu.memory_space<vmem>>, %arg15: memref<32x64xbf16, #tpu.memory_space<vmem>>, %arg16: memref<1x64xf32, #tpu.memory_space<vmem>>, %arg17: memref<32x64xbf16, #tpu.memory_space<vmem>>, %arg18: memref<1x64xf32, #tpu.memory_space<vmem>>, %arg19: memref<64x32xbf16, #tpu.memory_space<vmem>>, %arg20: memref<1x32xf32, #tpu.memory_space<vmem>>, %arg21: memref<1x8x32xf32, #tpu.memory_space<vmem>>) attributes {dimension_semantics = [#tpu.dimension_semantics<parallel>], iteration_bounds = array<i64: 2>, scalar_prefetch = 0 : i64, scratch_operands = 0 : i64, tpu.core_type = #tpu.core_type<tc>, window_params = [{transform_indices = @transform_0, window_bounds = array<i64: 1, 8, 32>}, {pipeline_mode = #tpu.pipeline_mode<synchronous>, transform_indices = @transform_1, window_bounds = array<i64: 1, 32>}, {pipeline_mode = #tpu.pipeline_mode<synchronous>, transform_indices = @transform_2, window_bounds = array<i64: 32, 32>}, {pipeline_mode = #tpu.pipeline_mode<synchronous>, transform_indices = @transform_3, window_bounds = array<i64: 1, 32>}, {pipeline_mode = #tpu.pipeline_mode<synchronous>, transform_indices = @transform_4, window_bounds = array<i64: 32, 32>}, {pipeline_mode = #tpu.pipeline_mode<synchronous>, transform_indices = @transform_5, window_bounds = array<i64: 1, 32>}, {pipeline_mode = #tpu.pipeline_mode<synchronous>, transform_indices = @transform_6, window_bounds = array<i64: 32, 32>}, {pipeline_mode = #tpu.pipeline_mode<synchronous>, transform_indices = @transform_7, window_bounds = array<i64: 1, 32>}, {pipeline_mode = #tpu.pipeline_mode<synchronous>, transform_indices = @transform_8, window_bounds = array<i64: 32, 32>}, {pipeline_mode = #tpu.pipeline_mode<synchronous>, transform_indices = @transform_9, window_bounds = array<i64: 1, 32>}, {pipeline_mode = #tpu.pipeline_mode<synchronous>, transform_indices = @transform_10, window_bounds = array<i64: 8, 32>}, {pipeline_mode = #tpu.pipeline_mode<synchronous>, transform_indices = @transform_11, window_bounds = array<i64: 8, 32>}, {pipeline_mode = #tpu.pipeline_mode<synchronous>, transform_indices = @transform_12, window_bounds = array<i64: 8, 32>}, {pipeline_mode = #tpu.pipeline_mode<synchronous>, transform_indices = @transform_13, window_bounds = array<i64: 8, 32>}, {pipeline_mode = #tpu.pipeline_mode<synchronous>, transform_indices = @transform_14, window_bounds = array<i64: 32, 64>}, {pipeline_mode = #tpu.pipeline_mode<synchronous>, transform_indices = @transform_15, window_bounds = array<i64: 1, 64>}, {pipeline_mode = #tpu.pipeline_mode<synchronous>, transform_indices = @transform_16, window_bounds = array<i64: 32, 64>}, {pipeline_mode = #tpu.pipeline_mode<synchronous>, transform_indices = @transform_17, window_bounds = array<i64: 1, 64>}, {pipeline_mode = #tpu.pipeline_mode<synchronous>, transform_indices = @transform_18, window_bounds = array<i64: 64, 32>}, {pipeline_mode = #tpu.pipeline_mode<synchronous>, transform_indices = @transform_19, window_bounds = array<i64: 1, 32>}, {transform_indices = @transform_20, window_bounds = array<i64: 1, 8, 32>}]} {
    %c0 = arith.constant 0 : index
    %c0_0 = arith.constant 0 : index
    %c0_1 = arith.constant 0 : index
    %0 = vector.load %arg1[%c0, %c0_0, %c0_1] : memref<1x8x32xf32, #tpu.memory_space<vmem>>, vector<1x8x32xf32>
    %1 = vector.shape_cast %0 : vector<1x8x32xf32> to vector<8x32xf32>
    %c0_2 = arith.constant 0 : index
    %c0_3 = arith.constant 0 : index
    %2 = vector.load %arg2[%c0_2, %c0_3] : memref<1x32xf32, #tpu.memory_space<vmem>>, vector<1x32xf32>
    %3 = arith.mulf %1, %1 : vector<8x32xf32>
    %cst = arith.constant dense<0.000000e+00> : vector<8xf32>
    %4 = vector.multi_reduction <add>, %3, %cst [1] : vector<8x32xf32> to vector<8xf32>
    %5 = vector.shape_cast %4 : vector<8xf32> to vector<8x1xf32>
    %cst_4 = arith.constant 3.200000e+01 : f32
    %6 = vector.broadcast %cst_4 : f32 to vector<8x1xf32>
    %7 = arith.divf %5, %6 : vector<8x1xf32>
    %cst_5 = arith.constant 9.99999993E-9 : f32
    %8 = vector.broadcast %cst_5 : f32 to vector<8x1xf32>
    %9 = arith.addf %7, %8 : vector<8x1xf32>
    %10 = math.rsqrt %9 : vector<8x1xf32>
    %11 = vector.broadcast %10 : vector<8x1xf32> to vector<8x32xf32>
    %12 = arith.mulf %1, %11 : vector<8x32xf32>
    %13 = vector.broadcast %2 : vector<1x32xf32> to vector<8x32xf32>
    %14 = arith.mulf %12, %13 : vector<8x32xf32>
    %15 = arith.truncf %14 : vector<8x32xf32> to vector<8x32xbf16>
    %c0_6 = arith.constant 0 : index
    %c0_7 = arith.constant 0 : index
    %16 = vector.load %arg3[%c0_6, %c0_7] : memref<32x32xbf16, #tpu.memory_space<vmem>>, vector<32x32xbf16>
    %cst_8 = arith.constant dense<0.000000e+00> : vector<8x32xf32>
    %17 = tpu.matmul %15, %16, %cst_8 {dimension_numbers = #tpu.dot_dimension_numbers<[1], [0], [0], [1], [0, 0, 1, 1], [], []>} : vector<8x32xbf16>, vector<32x32xbf16>, vector<8x32xf32> -> vector<8x32xf32>
    %c0_9 = arith.constant 0 : index
    %c0_10 = arith.constant 0 : index
    %18 = vector.load %arg4[%c0_9, %c0_10] : memref<1x32xf32, #tpu.memory_space<vmem>>, vector<1x32xf32>
    %19 = vector.broadcast %18 : vector<1x32xf32> to vector<8x32xf32>
    %20 = arith.addf %17, %19 : vector<8x32xf32>
    %c0_11 = arith.constant 0 : index
    %c0_12 = arith.constant 0 : index
    %21 = vector.load %arg5[%c0_11, %c0_12] : memref<32x32xbf16, #tpu.memory_space<vmem>>, vector<32x32xbf16>
    %cst_13 = arith.constant dense<0.000000e+00> : vector<8x32xf32>
    %22 = tpu.matmul %15, %21, %cst_13 {dimension_numbers = #tpu.dot_dimension_numbers<[1], [0], [0], [1], [0, 0, 1, 1], [], []>} : vector<8x32xbf16>, vector<32x32xbf16>, vector<8x32xf32> -> vector<8x32xf32>
    %c0_14 = arith.constant 0 : index
    %c0_15 = arith.constant 0 : index
    %23 = vector.load %arg6[%c0_14, %c0_15] : memref<1x32xf32, #tpu.memory_space<vmem>>, vector<1x32xf32>
    %24 = vector.broadcast %23 : vector<1x32xf32> to vector<8x32xf32>
    %25 = arith.addf %22, %24 : vector<8x32xf32>
    %c0_16 = arith.constant 0 : index
    %c0_17 = arith.constant 0 : index
    %26 = vector.load %arg7[%c0_16, %c0_17] : memref<32x32xbf16, #tpu.memory_space<vmem>>, vector<32x32xbf16>
    %cst_18 = arith.constant dense<0.000000e+00> : vector<8x32xf32>
    %27 = tpu.matmul %15, %26, %cst_18 {dimension_numbers = #tpu.dot_dimension_numbers<[1], [0], [0], [1], [0, 0, 1, 1], [], []>} : vector<8x32xbf16>, vector<32x32xbf16>, vector<8x32xf32> -> vector<8x32xf32>
    %c0_19 = arith.constant 0 : index
    %c0_20 = arith.constant 0 : index
    %28 = vector.load %arg8[%c0_19, %c0_20] : memref<1x32xf32, #tpu.memory_space<vmem>>, vector<1x32xf32>
    %29 = vector.broadcast %28 : vector<1x32xf32> to vector<8x32xf32>
    %30 = arith.addf %27, %29 : vector<8x32xf32>
    %c0_21 = arith.constant 0 : index
    %c0_22 = arith.constant 0 : index
    %31 = vector.load %arg11[%c0_21, %c0_22] : memref<8x32xf32, #tpu.memory_space<vmem>>, vector<8x32xf32>
    %c0_23 = arith.constant 0 : index
    %c0_24 = arith.constant 0 : index
    %32 = vector.load %arg12[%c0_23, %c0_24] : memref<8x32xf32, #tpu.memory_space<vmem>>, vector<8x32xf32>
    %c31_i32 = arith.constant 31 : i32
    %33 = tpu.dynamic_rotate %20 by %c31_i32 dim 1 : vector<8x32xf32>, i32 -> vector<8x32xf32>
    %34 = arith.mulf %20, %31 : vector<8x32xf32>
    %35 = arith.mulf %33, %32 : vector<8x32xf32>
    %36 = arith.addf %34, %35 : vector<8x32xf32>
    %c0_25 = arith.constant 0 : index
    %c0_26 = arith.constant 0 : index
    %37 = vector.load %arg13[%c0_25, %c0_26] : memref<8x32xf32, #tpu.memory_space<vmem>>, vector<8x32xf32>
    %c0_27 = arith.constant 0 : index
    %c0_28 = arith.constant 0 : index
    %38 = vector.load %arg14[%c0_27, %c0_28] : memref<8x32xf32, #tpu.memory_space<vmem>>, vector<8x32xf32>
    %c31_i32_29 = arith.constant 31 : i32
    %39 = tpu.dynamic_rotate %25 by %c31_i32_29 dim 1 : vector<8x32xf32>, i32 -> vector<8x32xf32>
    %40 = arith.mulf %25, %37 : vector<8x32xf32>
    %41 = arith.mulf %39, %38 : vector<8x32xf32>
    %42 = arith.addf %40, %41 : vector<8x32xf32>
    %43 = vector.extract_strided_slice %36 {offsets = [0, 0], sizes = [8, 8], strides = [1, 1]} : vector<8x32xf32> to vector<8x8xf32>
    %44 = vector.extract_strided_slice %36 {offsets = [0, 8], sizes = [8, 8], strides = [1, 1]} : vector<8x32xf32> to vector<8x8xf32>
    %45 = vector.extract_strided_slice %36 {offsets = [0, 16], sizes = [8, 8], strides = [1, 1]} : vector<8x32xf32> to vector<8x8xf32>
    %46 = vector.extract_strided_slice %36 {offsets = [0, 24], sizes = [8, 8], strides = [1, 1]} : vector<8x32xf32> to vector<8x8xf32>
    %47 = vector.shape_cast %43 : vector<8x8xf32> to vector<1x8x8xf32>
    %48 = vector.shape_cast %44 : vector<8x8xf32> to vector<1x8x8xf32>
    %49 = vector.shape_cast %45 : vector<8x8xf32> to vector<1x8x8xf32>
    %50 = vector.shape_cast %46 : vector<8x8xf32> to vector<1x8x8xf32>
    %51 = tpu.concatenate %47, %48, %49, %50 in 0 : vector<1x8x8xf32>, vector<1x8x8xf32>, vector<1x8x8xf32>, vector<1x8x8xf32> -> vector<4x8x8xf32>
    %52 = arith.truncf %51 : vector<4x8x8xf32> to vector<4x8x8xbf16>
    %53 = vector.extract_strided_slice %42 {offsets = [0, 0], sizes = [8, 8], strides = [1, 1]} : vector<8x32xf32> to vector<8x8xf32>
    %54 = vector.extract_strided_slice %42 {offsets = [0, 8], sizes = [8, 8], strides = [1, 1]} : vector<8x32xf32> to vector<8x8xf32>
    %55 = vector.extract_strided_slice %42 {offsets = [0, 16], sizes = [8, 8], strides = [1, 1]} : vector<8x32xf32> to vector<8x8xf32>
    %56 = vector.extract_strided_slice %42 {offsets = [0, 24], sizes = [8, 8], strides = [1, 1]} : vector<8x32xf32> to vector<8x8xf32>
    %57 = vector.shape_cast %53 : vector<8x8xf32> to vector<1x8x8xf32>
    %58 = vector.shape_cast %54 : vector<8x8xf32> to vector<1x8x8xf32>
    %59 = vector.shape_cast %55 : vector<8x8xf32> to vector<1x8x8xf32>
    %60 = vector.shape_cast %56 : vector<8x8xf32> to vector<1x8x8xf32>
    %61 = tpu.concatenate %57, %58, %59, %60 in 0 : vector<1x8x8xf32>, vector<1x8x8xf32>, vector<1x8x8xf32>, vector<1x8x8xf32> -> vector<4x8x8xf32>
    %62 = arith.truncf %61 : vector<4x8x8xf32> to vector<4x8x8xbf16>
    %63 = vector.extract_strided_slice %30 {offsets = [0, 0], sizes = [8, 8], strides = [1, 1]} : vector<8x32xf32> to vector<8x8xf32>
    %64 = vector.extract_strided_slice %30 {offsets = [0, 8], sizes = [8, 8], strides = [1, 1]} : vector<8x32xf32> to vector<8x8xf32>
    %65 = vector.extract_strided_slice %30 {offsets = [0, 16], sizes = [8, 8], strides = [1, 1]} : vector<8x32xf32> to vector<8x8xf32>
    %66 = vector.extract_strided_slice %30 {offsets = [0, 24], sizes = [8, 8], strides = [1, 1]} : vector<8x32xf32> to vector<8x8xf32>
    %67 = vector.shape_cast %63 : vector<8x8xf32> to vector<1x8x8xf32>
    %68 = vector.shape_cast %64 : vector<8x8xf32> to vector<1x8x8xf32>
    %69 = vector.shape_cast %65 : vector<8x8xf32> to vector<1x8x8xf32>
    %70 = vector.shape_cast %66 : vector<8x8xf32> to vector<1x8x8xf32>
    %71 = tpu.concatenate %67, %68, %69, %70 in 0 : vector<1x8x8xf32>, vector<1x8x8xf32>, vector<1x8x8xf32>, vector<1x8x8xf32> -> vector<4x8x8xf32>
    %72 = arith.truncf %71 : vector<4x8x8xf32> to vector<4x8x8xbf16>
    %cst_30 = arith.constant 0xFF800000 : f32
    %73 = vector.broadcast %cst_30 : f32 to vector<4x8x1xf32>
    %cst_31 = arith.constant 0.000000e+00 : f32
    %74 = vector.broadcast %cst_31 : f32 to vector<4x8x1xf32>
    %cst_32 = arith.constant 0.000000e+00 : f32
    %75 = vector.broadcast %cst_32 : f32 to vector<4x8x8xf32>
    "tpu.trace_start"() <{level = 10 : i32, message = "hqd,hkd->hqk"}> : () -> ()
    %cst_33 = arith.constant dense<0.000000e+00> : vector<4x8x8xf32>
    %76 = tpu.matmul %52, %62, %cst_33 {dimension_numbers = #tpu.dot_dimension_numbers<[2], [2], [1], [1], [0, 0, 0, 1, 1, 1], [0], [0]>} : vector<4x8x8xbf16>, vector<4x8x8xbf16>, vector<4x8x8xf32> -> vector<4x8x8xf32>
    "tpu.trace_stop"() : () -> ()
    %77 = tpu.iota {dimensions = array<i32: 0>} : vector<8x8xi32>
    %c0_i32 = arith.constant 0 : i32
    %78 = vector.broadcast %c0_i32 : i32 to vector<8x8xi32>
    %79 = arith.addi %77, %78 : vector<8x8xi32>
    %80 = tpu.iota {dimensions = array<i32: 1>} : vector<8x8xi32>
    %c0_i32_34 = arith.constant 0 : i32
    %81 = vector.broadcast %c0_i32_34 : i32 to vector<8x8xi32>
    %82 = arith.addi %80, %81 : vector<8x8xi32>
    %83 = arith.cmpi sge, %79, %82 : vector<8x8xi32>
    %84 = vector.shape_cast %83 : vector<8x8xi1> to vector<1x8x8xi1>
    %cst_35 = arith.constant -1.000000e+30 : f32
    %85 = vector.shape_cast %84 : vector<1x8x8xi1> to vector<1x8x8xi1>
    %86 = vector.broadcast %85 : vector<1x8x8xi1> to vector<4x8x8xi1>
    %87 = vector.broadcast %cst_35 : f32 to vector<4x8x8xf32>
    %88 = arith.select %86, %76, %87 : vector<4x8x8xi1>, vector<4x8x8xf32>
    %cst_36 = arith.constant dense<0xFF800000> : vector<4x8xf32>
    %89 = vector.multi_reduction <maximumf>, %88, %cst_36 [2] : vector<4x8x8xf32> to vector<4x8xf32>
    %90 = vector.shape_cast %89 : vector<4x8xf32> to vector<4x8x1xf32>
    %91 = arith.maximumf %73, %90 : vector<4x8x1xf32>
    %92 = arith.subf %73, %91 : vector<4x8x1xf32>
    %93 = math.exp %92 : vector<4x8x1xf32>
    %94 = vector.broadcast %91 : vector<4x8x1xf32> to vector<4x8x8xf32>
    %95 = arith.subf %88, %94 : vector<4x8x8xf32>
    %96 = math.exp %95 : vector<4x8x8xf32>
    %97 = arith.mulf %93, %74 : vector<4x8x1xf32>
    %cst_37 = arith.constant dense<0.000000e+00> : vector<4x8xf32>
    %98 = vector.multi_reduction <add>, %96, %cst_37 [2] : vector<4x8x8xf32> to vector<4x8xf32>
    %99 = vector.shape_cast %98 : vector<4x8xf32> to vector<4x8x1xf32>
    %100 = arith.addf %97, %99 : vector<4x8x1xf32>
    %101 = vector.broadcast %93 : vector<4x8x1xf32> to vector<4x8x8xf32>
    %102 = arith.mulf %101, %75 : vector<4x8x8xf32>
    %103 = arith.truncf %96 : vector<4x8x8xf32> to vector<4x8x8xbf16>
    "tpu.trace_start"() <{level = 10 : i32, message = "hqk,hkd->hqd"}> : () -> ()
    %cst_38 = arith.constant dense<0.000000e+00> : vector<4x8x8xf32>
    %104 = tpu.matmul %103, %72, %cst_38 {dimension_numbers = #tpu.dot_dimension_numbers<[2], [1], [1], [2], [0, 0, 0, 1, 1, 2], [0], [0]>} : vector<4x8x8xbf16>, vector<4x8x8xbf16>, vector<4x8x8xf32> -> vector<4x8x8xf32>
    "tpu.trace_stop"() : () -> ()
    %105 = arith.addf %102, %104 : vector<4x8x8xf32>
    %106 = tpu.reciprocal %100 {approx = true} : vector<4x8x1xf32> -> vector<4x8x1xf32>
    %107 = vector.broadcast %106 : vector<4x8x1xf32> to vector<4x8x8xf32>
    %108 = arith.mulf %105, %107 : vector<4x8x8xf32>
    %109 = vector.extract_strided_slice %108 {offsets = [0, 0, 0], sizes = [1, 8, 8], strides = [1, 1, 1]} : vector<4x8x8xf32> to vector<1x8x8xf32>
    %110 = vector.shape_cast %109 : vector<1x8x8xf32> to vector<8x8xf32>
    %111 = vector.extract_strided_slice %108 {offsets = [1, 0, 0], sizes = [1, 8, 8], strides = [1, 1, 1]} : vector<4x8x8xf32> to vector<1x8x8xf32>
    %112 = vector.shape_cast %111 : vector<1x8x8xf32> to vector<8x8xf32>
    %113 = vector.extract_strided_slice %108 {offsets = [2, 0, 0], sizes = [1, 8, 8], strides = [1, 1, 1]} : vector<4x8x8xf32> to vector<1x8x8xf32>
    %114 = vector.shape_cast %113 : vector<1x8x8xf32> to vector<8x8xf32>
    %115 = vector.extract_strided_slice %108 {offsets = [3, 0, 0], sizes = [1, 8, 8], strides = [1, 1, 1]} : vector<4x8x8xf32> to vector<1x8x8xf32>
    %116 = vector.shape_cast %115 : vector<1x8x8xf32> to vector<8x8xf32>
    %117 = tpu.concatenate %110, %112, %114, %116 in 1 : vector<8x8xf32>, vector<8x8xf32>, vector<8x8xf32>, vector<8x8xf32> -> vector<8x32xf32>
    %118 = arith.truncf %117 : vector<8x32xf32> to vector<8x32xbf16>
    %c0_39 = arith.constant 0 : index
    %c0_40 = arith.constant 0 : index
    %119 = vector.load %arg9[%c0_39, %c0_40] : memref<32x32xbf16, #tpu.memory_space<vmem>>, vector<32x32xbf16>
    %cst_41 = arith.constant dense<0.000000e+00> : vector<8x32xf32>
    %120 = tpu.matmul %118, %119, %cst_41 {dimension_numbers = #tpu.dot_dimension_numbers<[1], [0], [0], [1], [0, 0, 1, 1], [], []>} : vector<8x32xbf16>, vector<32x32xbf16>, vector<8x32xf32> -> vector<8x32xf32>
    %c0_42 = arith.constant 0 : index
    %c0_43 = arith.constant 0 : index
    %121 = vector.load %arg10[%c0_42, %c0_43] : memref<1x32xf32, #tpu.memory_space<vmem>>, vector<1x32xf32>
    %122 = vector.broadcast %121 : vector<1x32xf32> to vector<8x32xf32>
    %123 = arith.addf %120, %122 : vector<8x32xf32>
    %124 = arith.addf %1, %123 : vector<8x32xf32>
    %125 = arith.mulf %124, %124 : vector<8x32xf32>
    %cst_44 = arith.constant dense<0.000000e+00> : vector<8xf32>
    %126 = vector.multi_reduction <add>, %125, %cst_44 [1] : vector<8x32xf32> to vector<8xf32>
    %127 = vector.shape_cast %126 : vector<8xf32> to vector<8x1xf32>
    %cst_45 = arith.constant 3.200000e+01 : f32
    %128 = vector.broadcast %cst_45 : f32 to vector<8x1xf32>
    %129 = arith.divf %127, %128 : vector<8x1xf32>
    %cst_46 = arith.constant 9.99999993E-9 : f32
    %130 = vector.broadcast %cst_46 : f32 to vector<8x1xf32>
    %131 = arith.addf %129, %130 : vector<8x1xf32>
    %132 = math.rsqrt %131 : vector<8x1xf32>
    %133 = vector.broadcast %132 : vector<8x1xf32> to vector<8x32xf32>
    %134 = arith.mulf %124, %133 : vector<8x32xf32>
    %135 = vector.broadcast %2 : vector<1x32xf32> to vector<8x32xf32>
    %136 = arith.mulf %134, %135 : vector<8x32xf32>
    %137 = arith.truncf %136 : vector<8x32xf32> to vector<8x32xbf16>
    %cst_47 = arith.constant 0.000000e+00 : f32
    %138 = vector.broadcast %cst_47 : f32 to vector<8x32xf32>
    %c0_48 = arith.constant 0 : index
    %c0_49 = arith.constant 0 : index
    %139 = vector.load %arg15[%c0_48, %c0_49] : memref<32x64xbf16, #tpu.memory_space<vmem>>, vector<32x64xbf16>
    %cst_50 = arith.constant dense<0.000000e+00> : vector<8x64xf32>
    %140 = tpu.matmul %137, %139, %cst_50 {dimension_numbers = #tpu.dot_dimension_numbers<[1], [0], [0], [1], [0, 0, 1, 1], [], []>} : vector<8x32xbf16>, vector<32x64xbf16>, vector<8x64xf32> -> vector<8x64xf32>
    %c0_51 = arith.constant 0 : index
    %c0_52 = arith.constant 0 : index
    %141 = vector.load %arg16[%c0_51, %c0_52] : memref<1x64xf32, #tpu.memory_space<vmem>>, vector<1x64xf32>
    %142 = vector.broadcast %141 : vector<1x64xf32> to vector<8x64xf32>
    %143 = arith.addf %140, %142 : vector<8x64xf32>
    %c0_53 = arith.constant 0 : index
    %c0_54 = arith.constant 0 : index
    %144 = vector.load %arg17[%c0_53, %c0_54] : memref<32x64xbf16, #tpu.memory_space<vmem>>, vector<32x64xbf16>
    %cst_55 = arith.constant dense<0.000000e+00> : vector<8x64xf32>
    %145 = tpu.matmul %137, %144, %cst_55 {dimension_numbers = #tpu.dot_dimension_numbers<[1], [0], [0], [1], [0, 0, 1, 1], [], []>} : vector<8x32xbf16>, vector<32x64xbf16>, vector<8x64xf32> -> vector<8x64xf32>
    %c0_56 = arith.constant 0 : index
    %c0_57 = arith.constant 0 : index
    %146 = vector.load %arg18[%c0_56, %c0_57] : memref<1x64xf32, #tpu.memory_space<vmem>>, vector<1x64xf32>
    %147 = vector.broadcast %146 : vector<1x64xf32> to vector<8x64xf32>
    %148 = arith.addf %145, %147 : vector<8x64xf32>
    %149 = arith.negf %143 : vector<8x64xf32>
    %150 = math.exp %149 : vector<8x64xf32>
    %cst_58 = arith.constant 1.000000e+00 : f32
    %151 = vector.broadcast %cst_58 : f32 to vector<8x64xf32>
    %152 = arith.addf %151, %150 : vector<8x64xf32>
    %153 = arith.divf %151, %152 : vector<8x64xf32>
    %154 = arith.mulf %143, %153 : vector<8x64xf32>
    %155 = arith.mulf %154, %148 : vector<8x64xf32>
    %156 = arith.truncf %155 : vector<8x64xf32> to vector<8x64xbf16>
    %c0_59 = arith.constant 0 : index
    %c0_60 = arith.constant 0 : index
    %157 = vector.load %arg19[%c0_59, %c0_60] : memref<64x32xbf16, #tpu.memory_space<vmem>>, vector<64x32xbf16>
    %cst_61 = arith.constant dense<0.000000e+00> : vector<8x32xf32>
    %158 = tpu.matmul %156, %157, %cst_61 {dimension_numbers = #tpu.dot_dimension_numbers<[1], [0], [0], [1], [0, 0, 1, 1], [], []>} : vector<8x64xbf16>, vector<64x32xbf16>, vector<8x32xf32> -> vector<8x32xf32>
    %159 = arith.addf %138, %158 : vector<8x32xf32>
    %c0_62 = arith.constant 0 : index
    %c0_63 = arith.constant 0 : index
    %160 = vector.load %arg20[%c0_62, %c0_63] : memref<1x32xf32, #tpu.memory_space<vmem>>, vector<1x32xf32>
    %161 = vector.broadcast %160 : vector<1x32xf32> to vector<8x32xf32>
    %162 = arith.addf %159, %161 : vector<8x32xf32>
    %163 = arith.addf %124, %162 : vector<8x32xf32>
    %c0_64 = arith.constant 0 : index
    %c0_65 = arith.constant 0 : index
    %c0_66 = arith.constant 0 : index
    %164 = vector.load %arg21[%c0_64, %c0_65, %c0_66] : memref<1x8x32xf32, #tpu.memory_space<vmem>>, vector<1x8x32xf32>
    %165 = vector.shape_cast %164 : vector<1x8x32xf32> to vector<8x32xf32>
    %166 = vector.shape_cast %163 : vector<8x32xf32> to vector<1x8x32xf32>
    tpu.vector_store %arg21[%c0_64, %c0_65, %c0_66], %166 {strides = array<i32>} : memref<1x8x32xf32, #tpu.memory_space<vmem>>, vector<1x8x32xf32>,
    return
  }
  func.func @transform_0(%arg0: i32) -> (i32, i32, i32) {
    %c0_i32 = arith.constant 0 : i32
    %c0_i32_0 = arith.constant 0 : i32
    %c0_i32_1 = arith.constant 0 : i32
    return %arg0, %c0_i32, %c0_i32_0 : i32, i32, i32
  }
  func.func @transform_1(%arg0: i32) -> (i32, i32) {
    %c0_i32 = arith.constant 0 : i32
    %c0_i32_0 = arith.constant 0 : i32
    %c0_i32_1 = arith.constant 0 : i32
    return %c0_i32, %c0_i32_0 : i32, i32
  }
  func.func @transform_2(%arg0: i32) -> (i32, i32) {
    %c0_i32 = arith.constant 0 : i32
    %c0_i32_0 = arith.constant 0 : i32
    %c0_i32_1 = arith.constant 0 : i32
    return %c0_i32, %c0_i32_0 : i32, i32
  }
  func.func @transform_3(%arg0: i32) -> (i32, i32) {
    %c0_i32 = arith.constant 0 : i32
    %c0_i32_0 = arith.constant 0 : i32
    %c0_i32_1 = arith.constant 0 : i32
    return %c0_i32, %c0_i32_0 : i32, i32
  }
  func.func @transform_4(%arg0: i32) -> (i32, i32) {
    %c0_i32 = arith.constant 0 : i32
    %c0_i32_0 = arith.constant 0 : i32
    %c0_i32_1 = arith.constant 0 : i32
    return %c0_i32, %c0_i32_0 : i32, i32
  }
  func.func @transform_5(%arg0: i32) -> (i32, i32) {
    %c0_i32 = arith.constant 0 : i32
    %c0_i32_0 = arith.constant 0 : i32
    %c0_i32_1 = arith.constant 0 : i32
    return %c0_i32, %c0_i32_0 : i32, i32
  }
  func.func @transform_6(%arg0: i32) -> (i32, i32) {
    %c0_i32 = arith.constant 0 : i32
    %c0_i32_0 = arith.constant 0 : i32
    %c0_i32_1 = arith.constant 0 : i32
    return %c0_i32, %c0_i32_0 : i32, i32
  }
  func.func @transform_7(%arg0: i32) -> (i32, i32) {
    %c0_i32 = arith.constant 0 : i32
    %c0_i32_0 = arith.constant 0 : i32
    %c0_i32_1 = arith.constant 0 : i32
    return %c0_i32, %c0_i32_0 : i32, i32
  }
  func.func @transform_8(%arg0: i32) -> (i32, i32) {
    %c0_i32 = arith.constant 0 : i32
    %c0_i32_0 = arith.constant 0 : i32
    %c0_i32_1 = arith.constant 0 : i32
    return %c0_i32, %c0_i32_0 : i32, i32
  }
  func.func @transform_9(%arg0: i32) -> (i32, i32) {
    %c0_i32 = arith.constant 0 : i32
    %c0_i32_0 = arith.constant 0 : i32
    %c0_i32_1 = arith.constant 0 : i32
    return %c0_i32, %c0_i32_0 : i32, i32
  }
  func.func @transform_10(%arg0: i32) -> (i32, i32) {
    %c0_i32 = arith.constant 0 : i32
    %c0_i32_0 = arith.constant 0 : i32
    %c0_i32_1 = arith.constant 0 : i32
    return %c0_i32, %c0_i32_0 : i32, i32
  }
  func.func @transform_11(%arg0: i32) -> (i32, i32) {
    %c0_i32 = arith.constant 0 : i32
    %c0_i32_0 = arith.constant 0 : i32
    %c0_i32_1 = arith.constant 0 : i32
    return %c0_i32, %c0_i32_0 : i32, i32
  }
  func.func @transform_12(%arg0: i32) -> (i32, i32) {
    %c0_i32 = arith.constant 0 : i32
    %c0_i32_0 = arith.constant 0 : i32
    %c0_i32_1 = arith.constant 0 : i32
    return %c0_i32, %c0_i32_0 : i32, i32
  }
  func.func @transform_13(%arg0: i32) -> (i32, i32) {
    %c0_i32 = arith.constant 0 : i32
    %c0_i32_0 = arith.constant 0 : i32
    %c0_i32_1 = arith.constant 0 : i32
    return %c0_i32, %c0_i32_0 : i32, i32
  }
  func.func @transform_14(%arg0: i32) -> (i32, i32) {
    %c0_i32 = arith.constant 0 : i32
    %c0_i32_0 = arith.constant 0 : i32
    %c0_i32_1 = arith.constant 0 : i32
    return %c0_i32, %c0_i32_0 : i32, i32
  }
  func.func @transform_15(%arg0: i32) -> (i32, i32) {
    %c0_i32 = arith.constant 0 : i32
    %c0_i32_0 = arith.constant 0 : i32
    %c0_i32_1 = arith.constant 0 : i32
    return %c0_i32, %c0_i32_0 : i32, i32
  }
  func.func @transform_16(%arg0: i32) -> (i32, i32) {
    %c0_i32 = arith.constant 0 : i32
    %c0_i32_0 = arith.constant 0 : i32
    %c0_i32_1 = arith.constant 0 : i32
    return %c0_i32, %c0_i32_0 : i32, i32
  }
  func.func @transform_17(%arg0: i32) -> (i32, i32) {
    %c0_i32 = arith.constant 0 : i32
    %c0_i32_0 = arith.constant 0 : i32
    %c0_i32_1 = arith.constant 0 : i32
    return %c0_i32, %c0_i32_0 : i32, i32
  }
  func.func @transform_18(%arg0: i32) -> (i32, i32) {
    %c0_i32 = arith.constant 0 : i32
    %c0_i32_0 = arith.constant 0 : i32
    %c0_i32_1 = arith.constant 0 : i32
    return %c0_i32, %c0_i32_0 : i32, i32
  }
  func.func @transform_19(%arg0: i32) -> (i32, i32) {
    %c0_i32 = arith.constant 0 : i32
    %c0_i32_0 = arith.constant 0 : i32
    %c0_i32_1 = arith.constant 0 : i32
    return %c0_i32, %c0_i32_0 : i32, i32
  }
  func.func @transform_20(%arg0: i32) -> (i32, i32, i32) {
    %c0_i32 = arith.constant 0 : i32
    %c0_i32_0 = arith.constant 0 : i32
    %c0_i32_1 = arith.constant 0 : i32
    return %arg0, %c0_i32, %c0_i32_0 : i32, i32, i32
  }
}

module attributes {stable_mosaic.version = 11 : i64} {
  func.func @_llama_block_kernel(%arg0: i32, %arg1: memref<1x8x32xf32, #tpu.memory_space<vmem>>, %arg2: memref<1x32xf32, #tpu.memory_space<vmem>>, %arg3: memref<32x32xbf16, #tpu.memory_space<vmem>>, %arg4: memref<1x32xf32, #tpu.memory_space<vmem>>, %arg5: memref<32x32xbf16, #tpu.memory_space<vmem>>, %arg6: memref<1x32xf32, #tpu.memory_space<vmem>>, %arg7: memref<32x32xbf16, #tpu.memory_space<vmem>>, %arg8: memref<1x32xf32, #tpu.memory_space<vmem>>, %arg9: memref<32x32xbf16, #tpu.memory_space<vmem>>, %arg10: memref<1x32xf32, #tpu.memory_space<vmem>>, %arg11: memref<8x32xf32, #tpu.memory_space<vmem>>, %arg12: memref<8x32xf32, #tpu.memory_space<vmem>>, %arg13: memref<8x32xf32, #tpu.memory_space<vmem>>, %arg14: memref<8x32xf32, #tpu.memory_space<vmem>>, %arg15: memref<32x64xbf16, #tpu.memory_space<vmem>>, %arg16: memref<1x64xf32, #tpu.memory_space<vmem>>, %arg17: memref<32x64xbf16, #tpu.memory_space<vmem>>, %arg18: memref<1x64xf32, #tpu.memory_space<vmem>>, %arg19: memref<64x32xbf16, #tpu.memory_space<vmem>>, %arg20: memref<1x32xf32, #tpu.memory_space<vmem>>, %arg21: memref<1x8x32xf32, #tpu.memory_space<vmem>>) attributes {dimension_semantics = [#tpu.dimension_semantics<parallel>], iteration_bounds = array<i64: 2>, scalar_prefetch = 0 : i64, scratch_operands = 0 : i64, tpu.core_type = #tpu.core_type<tc>, window_params = [{transform_indices = @transform_0, window_bounds = array<i64: 1, 8, 32>}, {pipeline_mode = #tpu.pipeline_mode<synchronous>, transform_indices = @transform_1, window_bounds = array<i64: 1, 32>}, {pipeline_mode = #tpu.pipeline_mode<synchronous>, transform_indices = @transform_2, window_bounds = array<i64: 32, 32>}, {pipeline_mode = #tpu.pipeline_mode<synchronous>, transform_indices = @transform_3, window_bounds = array<i64: 1, 32>}, {pipeline_mode = #tpu.pipeline_mode<synchronous>, transform_indices = @transform_4, window_bounds = array<i64: 32, 32>}, {pipeline_mode = #tpu.pipeline_mode<synchronous>, transform_indices = @transform_5, window_bounds = array<i64: 1, 32>}, {pipeline_mode = #tpu.pipeline_mode<synchronous>, transform_indices = @transform_6, window_bounds = array<i64: 32, 32>}, {pipeline_mode = #tpu.pipeline_mode<synchronous>, transform_indices = @transform_7, window_bounds = array<i64: 1, 32>}, {pipeline_mode = #tpu.pipeline_mode<synchronous>, transform_indices = @transform_8, window_bounds = array<i64: 32, 32>}, {pipeline_mode = #tpu.pipeline_mode<synchronous>, transform_indices = @transform_9, window_bounds = array<i64: 1, 32>}, {pipeline_mode = #tpu.pipeline_mode<synchronous>, transform_indices = @transform_10, window_bounds = array<i64: 8, 32>}, {pipeline_mode = #tpu.pipeline_mode<synchronous>, transform_indices = @transform_11, window_bounds = array<i64: 8, 32>}, {pipeline_mode = #tpu.pipeline_mode<synchronous>, transform_indices = @transform_12, window_bounds = array<i64: 8, 32>}, {pipeline_mode = #tpu.pipeline_mode<synchronous>, transform_indices = @transform_13, window_bounds = array<i64: 8, 32>}, {pipeline_mode = #tpu.pipeline_mode<synchronous>, transform_indices = @transform_14, window_bounds = array<i64: 32, 64>}, {pipeline_mode = #tpu.pipeline_mode<synchronous>, transform_indices = @transform_15, window_bounds = array<i64: 1, 64>}, {pipeline_mode = #tpu.pipeline_mode<synchronous>, transform_indices = @transform_16, window_bounds = array<i64: 32, 64>}, {pipeline_mode = #tpu.pipeline_mode<synchronous>, transform_indices = @transform_17, window_bounds = array<i64: 1, 64>}, {pipeline_mode = #tpu.pipeline_mode<synchronous>, transform_indices = @transform_18, window_bounds = array<i64: 64, 32>}, {pipeline_mode = #tpu.pipeline_mode<synchronous>, transform_indices = @transform_19, window_bounds = array<i64: 1, 32>}, {transform_indices = @transform_20, window_bounds = array<i64: 1, 8, 32>}]} {
    %c0 = arith.constant 0 : index
    %c0_0 = arith.constant 0 : index
    %c0_1 = arith.constant 0 : index
    %0 = vector.load %arg1[%c0, %c0_0, %c0_1] : memref<1x8x32xf32, #tpu.memory_space<vmem>>, vector<1x8x32xf32>
    %1 = vector.shape_cast %0 : vector<1x8x32xf32> to vector<8x32xf32>
    %c0_2 = arith.constant 0 : index
    %c0_3 = arith.constant 0 : index
    %2 = vector.load %arg2[%c0_2, %c0_3] : memref<1x32xf32, #tpu.memory_space<vmem>>, vector<1x32xf32>
    %3 = arith.mulf %1, %1 : vector<8x32xf32>
    %cst = arith.constant dense<0.000000e+00> : vector<8xf32>
    %4 = vector.multi_reduction <add>, %3, %cst [1] : vector<8x32xf32> to vector<8xf32>
    %5 = vector.shape_cast %4 : vector<8xf32> to vector<8x1xf32>
    %cst_4 = arith.constant 3.200000e+01 : f32
    %6 = vector.broadcast %cst_4 : f32 to vector<8x1xf32>
    %7 = arith.divf %5, %6 : vector<8x1xf32>
    %cst_5 = arith.constant 9.99999993E-9 : f32
    %8 = vector.broadcast %cst_5 : f32 to vector<8x1xf32>
    %9 = arith.addf %7, %8 : vector<8x1xf32>
    %10 = math.rsqrt %9 : vector<8x1xf32>
    %11 = vector.broadcast %10 : vector<8x1xf32> to vector<8x32xf32>
    %12 = arith.mulf %1, %11 : vector<8x32xf32>
    %13 = vector.broadcast %2 : vector<1x32xf32> to vector<8x32xf32>
    %14 = arith.mulf %12, %13 : vector<8x32xf32>
    %15 = arith.truncf %14 : vector<8x32xf32> to vector<8x32xbf16>
    %c0_6 = arith.constant 0 : index
    %c0_7 = arith.constant 0 : index
    %16 = vector.load %arg3[%c0_6, %c0_7] : memref<32x32xbf16, #tpu.memory_space<vmem>>, vector<32x32xbf16>
    %cst_8 = arith.constant dense<0.000000e+00> : vector<8x32xf32>
    %17 = tpu.matmul %15, %16, %cst_8 {dimension_numbers = #tpu.dot_dimension_numbers<[1], [0], [0], [1], [0, 0, 1, 1], [], []>} : vector<8x32xbf16>, vector<32x32xbf16>, vector<8x32xf32> -> vector<8x32xf32>
    %c0_9 = arith.constant 0 : index
    %c0_10 = arith.constant 0 : index
    %18 = vector.load %arg4[%c0_9, %c0_10] : memref<1x32xf32, #tpu.memory_space<vmem>>, vector<1x32xf32>
    %19 = vector.broadcast %18 : vector<1x32xf32> to vector<8x32xf32>
    %20 = arith.addf %17, %19 : vector<8x32xf32>
    %c0_11 = arith.constant 0 : index
    %c0_12 = arith.constant 0 : index
    %21 = vector.load %arg5[%c0_11, %c0_12] : memref<32x32xbf16, #tpu.memory_space<vmem>>, vector<32x32xbf16>
    %cst_13 = arith.constant dense<0.000000e+00> : vector<8x32xf32>
    %22 = tpu.matmul %15, %21, %cst_13 {dimension_numbers = #tpu.dot_dimension_numbers<[1], [0], [0], [1], [0, 0, 1, 1], [], []>} : vector<8x32xbf16>, vector<32x32xbf16>, vector<8x32xf32> -> vector<8x32xf32>
    %c0_14 = arith.constant 0 : index
    %c0_15 = arith.constant 0 : index
    %23 = vector.load %arg6[%c0_14, %c0_15] : memref<1x32xf32, #tpu.memory_space<vmem>>, vector<1x32xf32>
    %24 = vector.broadcast %23 : vector<1x32xf32> to vector<8x32xf32>
    %25 = arith.addf %22, %24 : vector<8x32xf32>
    %c0_16 = arith.constant 0 : index
    %c0_17 = arith.constant 0 : index
    %26 = vector.load %arg7[%c0_16, %c0_17] : memref<32x32xbf16, #tpu.memory_space<vmem>>, vector<32x32xbf16>
    %cst_18 = arith.constant dense<0.000000e+00> : vector<8x32xf32>
    %27 = tpu.matmul %15, %26, %cst_18 {dimension_numbers = #tpu.dot_dimension_numbers<[1], [0], [0], [1], [0, 0, 1, 1], [], []>} : vector<8x32xbf16>, vector<32x32xbf16>, vector<8x32xf32> -> vector<8x32xf32>
    %c0_19 = arith.constant 0 : index
    %c0_20 = arith.constant 0 : index
    %28 = vector.load %arg8[%c0_19, %c0_20] : memref<1x32xf32, #tpu.memory_space<vmem>>, vector<1x32xf32>
    %29 = vector.broadcast %28 : vector<1x32xf32> to vector<8x32xf32>
    %30 = arith.addf %27, %29 : vector<8x32xf32>
    %c0_21 = arith.constant 0 : index
    %c0_22 = arith.constant 0 : index
    %31 = vector.load %arg11[%c0_21, %c0_22] : memref<8x32xf32, #tpu.memory_space<vmem>>, vector<8x32xf32>
    %c0_23 = arith.constant 0 : index
    %c0_24 = arith.constant 0 : index
    %32 = vector.load %arg12[%c0_23, %c0_24] : memref<8x32xf32, #tpu.memory_space<vmem>>, vector<8x32xf32>
    %c31_i32 = arith.constant 31 : i32
    %33 = tpu.dynamic_rotate %20 by %c31_i32 dim 1 : vector<8x32xf32>, i32 -> vector<8x32xf32>
    %34 = arith.mulf %20, %31 : vector<8x32xf32>
    %35 = arith.mulf %33, %32 : vector<8x32xf32>
    %36 = arith.addf %34, %35 : vector<8x32xf32>
    %c0_25 = arith.constant 0 : index
    %c0_26 = arith.constant 0 : index
    %37 = vector.load %arg13[%c0_25, %c0_26] : memref<8x32xf32, #tpu.memory_space<vmem>>, vector<8x32xf32>
    %c0_27 = arith.constant 0 : index
    %c0_28 = arith.constant 0 : index
    %38 = vector.load %arg14[%c0_27, %c0_28] : memref<8x32xf32, #tpu.memory_space<vmem>>, vector<8x32xf32>
    %c31_i32_29 = arith.constant 31 : i32
    %39 = tpu.dynamic_rotate %25 by %c31_i32_29 dim 1 : vector<8x32xf32>, i32 -> vector<8x32xf32>
    %40 = arith.mulf %25, %37 : vector<8x32xf32>
    %41 = arith.mulf %39, %38 : vector<8x32xf32>
    %42 = arith.addf %40, %41 : vector<8x32xf32>
    %43 = vector.extract_strided_slice %36 {offsets = [0, 0], sizes = [8, 8], strides = [1, 1]} : vector<8x32xf32> to vector<8x8xf32>
    %44 = vector.extract_strided_slice %36 {offsets = [0, 8], sizes = [8, 8], strides = [1, 1]} : vector<8x32xf32> to vector<8x8xf32>
    %45 = vector.extract_strided_slice %36 {offsets = [0, 16], sizes = [8, 8], strides = [1, 1]} : vector<8x32xf32> to vector<8x8xf32>
    %46 = vector.extract_strided_slice %36 {offsets = [0, 24], sizes = [8, 8], strides = [1, 1]} : vector<8x32xf32> to vector<8x8xf32>
    %47 = vector.shape_cast %43 : vector<8x8xf32> to vector<1x8x8xf32>
    %48 = vector.shape_cast %44 : vector<8x8xf32> to vector<1x8x8xf32>
    %49 = vector.shape_cast %45 : vector<8x8xf32> to vector<1x8x8xf32>
    %50 = vector.shape_cast %46 : vector<8x8xf32> to vector<1x8x8xf32>
    %51 = tpu.concatenate %47, %48, %49, %50 in 0 : vector<1x8x8xf32>, vector<1x8x8xf32>, vector<1x8x8xf32>, vector<1x8x8xf32> -> vector<4x8x8xf32>
    %52 = arith.truncf %51 : vector<4x8x8xf32> to vector<4x8x8xbf16>
    %53 = vector.extract_strided_slice %42 {offsets = [0, 0], sizes = [8, 8], strides = [1, 1]} : vector<8x32xf32> to vector<8x8xf32>
    %54 = vector.extract_strided_slice %42 {offsets = [0, 8], sizes = [8, 8], strides = [1, 1]} : vector<8x32xf32> to vector<8x8xf32>
    %55 = vector.extract_strided_slice %42 {offsets = [0, 16], sizes = [8, 8], strides = [1, 1]} : vector<8x32xf32> to vector<8x8xf32>
    %56 = vector.extract_strided_slice %42 {offsets = [0, 24], sizes = [8, 8], strides = [1, 1]} : vector<8x32xf32> to vector<8x8xf32>
    %57 = vector.shape_cast %53 : vector<8x8xf32> to vector<1x8x8xf32>
    %58 = vector.shape_cast %54 : vector<8x8xf32> to vector<1x8x8xf32>
    %59 = vector.shape_cast %55 : vector<8x8xf32> to vector<1x8x8xf32>
    %60 = vector.shape_cast %56 : vector<8x8xf32> to vector<1x8x8xf32>
    %61 = tpu.concatenate %57, %58, %59, %60 in 0 : vector<1x8x8xf32>, vector<1x8x8xf32>, vector<1x8x8xf32>, vector<1x8x8xf32> -> vector<4x8x8xf32>
    %62 = arith.truncf %61 : vector<4x8x8xf32> to vector<4x8x8xbf16>
    %63 = vector.extract_strided_slice %30 {offsets = [0, 0], sizes = [8, 8], strides = [1, 1]} : vector<8x32xf32> to vector<8x8xf32>
    %64 = vector.extract_strided_slice %30 {offsets = [0, 8], sizes = [8, 8], strides = [1, 1]} : vector<8x32xf32> to vector<8x8xf32>
    %65 = vector.extract_strided_slice %30 {offsets = [0, 16], sizes = [8, 8], strides = [1, 1]} : vector<8x32xf32> to vector<8x8xf32>
    %66 = vector.extract_strided_slice %30 {offsets = [0, 24], sizes = [8, 8], strides = [1, 1]} : vector<8x32xf32> to vector<8x8xf32>
    %67 = vector.shape_cast %63 : vector<8x8xf32> to vector<1x8x8xf32>
    %68 = vector.shape_cast %64 : vector<8x8xf32> to vector<1x8x8xf32>
    %69 = vector.shape_cast %65 : vector<8x8xf32> to vector<1x8x8xf32>
    %70 = vector.shape_cast %66 : vector<8x8xf32> to vector<1x8x8xf32>
    %71 = tpu.concatenate %67, %68, %69, %70 in 0 : vector<1x8x8xf32>, vector<1x8x8xf32>, vector<1x8x8xf32>, vector<1x8x8xf32> -> vector<4x8x8xf32>
    %72 = arith.truncf %71 : vector<4x8x8xf32> to vector<4x8x8xbf16>
    %cst_30 = arith.constant 0xFF800000 : f32
    %73 = vector.broadcast %cst_30 : f32 to vector<4x8x1xf32>
    %cst_31 = arith.constant 0.000000e+00 : f32
    %74 = vector.broadcast %cst_31 : f32 to vector<4x8x1xf32>
    %cst_32 = arith.constant 0.000000e+00 : f32
    %75 = vector.broadcast %cst_32 : f32 to vector<4x8x8xf32>
    "tpu.trace_start"() <{level = 10 : i32, message = "hqd,hkd->hqk"}> : () -> ()
    %cst_33 = arith.constant dense<0.000000e+00> : vector<4x8x8xf32>
    %76 = tpu.matmul %52, %62, %cst_33 {dimension_numbers = #tpu.dot_dimension_numbers<[2], [2], [1], [1], [0, 0, 0, 1, 1, 1], [0], [0]>} : vector<4x8x8xbf16>, vector<4x8x8xbf16>, vector<4x8x8xf32> -> vector<4x8x8xf32>
    "tpu.trace_stop"() : () -> ()
    %77 = tpu.iota {dimensions = array<i32: 0>} : vector<8x8xi32>
    %c0_i32 = arith.constant 0 : i32
    %78 = vector.broadcast %c0_i32 : i32 to vector<8x8xi32>
    %79 = arith.addi %77, %78 : vector<8x8xi32>
    %80 = tpu.iota {dimensions = array<i32: 1>} : vector<8x8xi32>
    %c0_i32_34 = arith.constant 0 : i32
    %81 = vector.broadcast %c0_i32_34 : i32 to vector<8x8xi32>
    %82 = arith.addi %80, %81 : vector<8x8xi32>
    %83 = arith.cmpi sge, %79, %82 : vector<8x8xi32>
    %84 = vector.shape_cast %83 : vector<8x8xi1> to vector<1x8x8xi1>
    %cst_35 = arith.constant -1.000000e+30 : f32
    %85 = vector.shape_cast %84 : vector<1x8x8xi1> to vector<1x8x8xi1>
    %86 = vector.broadcast %85 : vector<1x8x8xi1> to vector<4x8x8xi1>
    %87 = vector.broadcast %cst_35 : f32 to vector<4x8x8xf32>
    %88 = arith.select %86, %76, %87 : vector<4x8x8xi1>, vector<4x8x8xf32>
    %cst_36 = arith.constant dense<0xFF800000> : vector<4x8xf32>
    %89 = vector.multi_reduction <maximumf>, %88, %cst_36 [2] : vector<4x8x8xf32> to vector<4x8xf32>
    %90 = vector.shape_cast %89 : vector<4x8xf32> to vector<4x8x1xf32>
    %91 = arith.maximumf %73, %90 : vector<4x8x1xf32>
    %92 = arith.subf %73, %91 : vector<4x8x1xf32>
    %93 = math.exp %92 : vector<4x8x1xf32>
    %94 = vector.broadcast %91 : vector<4x8x1xf32> to vector<4x8x8xf32>
    %95 = arith.subf %88, %94 : vector<4x8x8xf32>
    %96 = math.exp %95 : vector<4x8x8xf32>
    %97 = arith.mulf %93, %74 : vector<4x8x1xf32>
    %cst_37 = arith.constant dense<0.000000e+00> : vector<4x8xf32>
    %98 = vector.multi_reduction <add>, %96, %cst_37 [2] : vector<4x8x8xf32> to vector<4x8xf32>
    %99 = vector.shape_cast %98 : vector<4x8xf32> to vector<4x8x1xf32>
    %100 = arith.addf %97, %99 : vector<4x8x1xf32>
    %101 = vector.broadcast %93 : vector<4x8x1xf32> to vector<4x8x8xf32>
    %102 = arith.mulf %101, %75 : vector<4x8x8xf32>
    %103 = arith.truncf %96 : vector<4x8x8xf32> to vector<4x8x8xbf16>
    "tpu.trace_start"() <{level = 10 : i32, message = "hqk,hkd->hqd"}> : () -> ()
    %cst_38 = arith.constant dense<0.000000e+00> : vector<4x8x8xf32>
    %104 = tpu.matmul %103, %72, %cst_38 {dimension_numbers = #tpu.dot_dimension_numbers<[2], [1], [1], [2], [0, 0, 0, 1, 1, 2], [0], [0]>} : vector<4x8x8xbf16>, vector<4x8x8xbf16>, vector<4x8x8xf32> -> vector<4x8x8xf32>
    "tpu.trace_stop"() : () -> ()
    %105 = arith.addf %102, %104 : vector<4x8x8xf32>
    %106 = tpu.reciprocal %100 {approx = true} : vector<4x8x1xf32> -> vector<4x8x1xf32>
    %107 = vector.broadcast %106 : vector<4x8x1xf32> to vector<4x8x8xf32>
    %108 = arith.mulf %105, %107 : vector<4x8x8xf32>
    %109 = vector.extract_strided_slice %108 {offsets = [0, 0, 0], sizes = [1, 8, 8], strides = [1, 1, 1]} : vector<4x8x8xf32> to vector<1x8x8xf32>
    %110 = vector.shape_cast %109 : vector<1x8x8xf32> to vector<8x8xf32>
    %111 = vector.extract_strided_slice %108 {offsets = [1, 0, 0], sizes = [1, 8, 8], strides = [1, 1, 1]} : vector<4x8x8xf32> to vector<1x8x8xf32>
    %112 = vector.shape_cast %111 : vector<1x8x8xf32> to vector<8x8xf32>
    %113 = vector.extract_strided_slice %108 {offsets = [2, 0, 0], sizes = [1, 8, 8], strides = [1, 1, 1]} : vector<4x8x8xf32> to vector<1x8x8xf32>
    %114 = vector.shape_cast %113 : vector<1x8x8xf32> to vector<8x8xf32>
    %115 = vector.extract_strided_slice %108 {offsets = [3, 0, 0], sizes = [1, 8, 8], strides = [1, 1, 1]} : vector<4x8x8xf32> to vector<1x8x8xf32>
    %116 = vector.shape_cast %115 : vector<1x8x8xf32> to vector<8x8xf32>
    %117 = tpu.concatenate %110, %112, %114, %116 in 1 : vector<8x8xf32>, vector<8x8xf32>, vector<8x8xf32>, vector<8x8xf32> -> vector<8x32xf32>
    %118 = arith.truncf %117 : vector<8x32xf32> to vector<8x32xbf16>
    %c0_39 = arith.constant 0 : index
    %c0_40 = arith.constant 0 : index
    %119 = vector.load %arg9[%c0_39, %c0_40] : memref<32x32xbf16, #tpu.memory_space<vmem>>, vector<32x32xbf16>
    %cst_41 = arith.constant dense<0.000000e+00> : vector<8x32xf32>
    %120 = tpu.matmul %118, %119, %cst_41 {dimension_numbers = #tpu.dot_dimension_numbers<[1], [0], [0], [1], [0, 0, 1, 1], [], []>} : vector<8x32xbf16>, vector<32x32xbf16>, vector<8x32xf32> -> vector<8x32xf32>
    %c0_42 = arith.constant 0 : index
    %c0_43 = arith.constant 0 : index
    %121 = vector.load %arg10[%c0_42, %c0_43] : memref<1x32xf32, #tpu.memory_space<vmem>>, vector<1x32xf32>
    %122 = vector.broadcast %121 : vector<1x32xf32> to vector<8x32xf32>
    %123 = arith.addf %120, %122 : vector<8x32xf32>
    %124 = arith.addf %1, %123 : vector<8x32xf32>
    %125 = arith.mulf %124, %124 : vector<8x32xf32>
    %cst_44 = arith.constant dense<0.000000e+00> : vector<8xf32>
    %126 = vector.multi_reduction <add>, %125, %cst_44 [1] : vector<8x32xf32> to vector<8xf32>
    %127 = vector.shape_cast %126 : vector<8xf32> to vector<8x1xf32>
    %cst_45 = arith.constant 3.200000e+01 : f32
    %128 = vector.broadcast %cst_45 : f32 to vector<8x1xf32>
    %129 = arith.divf %127, %128 : vector<8x1xf32>
    %cst_46 = arith.constant 9.99999993E-9 : f32
    %130 = vector.broadcast %cst_46 : f32 to vector<8x1xf32>
    %131 = arith.addf %129, %130 : vector<8x1xf32>
    %132 = math.rsqrt %131 : vector<8x1xf32>
    %133 = vector.broadcast %132 : vector<8x1xf32> to vector<8x32xf32>
    %134 = arith.mulf %124, %133 : vector<8x32xf32>
    %135 = vector.broadcast %2 : vector<1x32xf32> to vector<8x32xf32>
    %136 = arith.mulf %134, %135 : vector<8x32xf32>
    %137 = arith.truncf %136 : vector<8x32xf32> to vector<8x32xbf16>
    %cst_47 = arith.constant 0.000000e+00 : f32
    %138 = vector.broadcast %cst_47 : f32 to vector<8x32xf32>
    %c0_48 = arith.constant 0 : index
    %c0_49 = arith.constant 0 : index
    %139 = vector.load %arg15[%c0_48, %c0_49] : memref<32x64xbf16, #tpu.memory_space<vmem>>, vector<32x64xbf16>
    %cst_50 = arith.constant dense<0.000000e+00> : vector<8x64xf32>
    %140 = tpu.matmul %137, %139, %cst_50 {dimension_numbers = #tpu.dot_dimension_numbers<[1], [0], [0], [1], [0, 0, 1, 1], [], []>} : vector<8x32xbf16>, vector<32x64xbf16>, vector<8x64xf32> -> vector<8x64xf32>
    %c0_51 = arith.constant 0 : index
    %c0_52 = arith.constant 0 : index
    %141 = vector.load %arg16[%c0_51, %c0_52] : memref<1x64xf32, #tpu.memory_space<vmem>>, vector<1x64xf32>
    %142 = vector.broadcast %141 : vector<1x64xf32> to vector<8x64xf32>
    %143 = arith.addf %140, %142 : vector<8x64xf32>
    %c0_53 = arith.constant 0 : index
    %c0_54 = arith.constant 0 : index
    %144 = vector.load %arg17[%c0_53, %c0_54] : memref<32x64xbf16, #tpu.memory_space<vmem>>, vector<32x64xbf16>
    %cst_55 = arith.constant dense<0.000000e+00> : vector<8x64xf32>
    %145 = tpu.matmul %137, %144, %cst_55 {dimension_numbers = #tpu.dot_dimension_numbers<[1], [0], [0], [1], [0, 0, 1, 1], [], []>} : vector<8x32xbf16>, vector<32x64xbf16>, vector<8x64xf32> -> vector<8x64xf32>
    %c0_56 = arith.constant 0 : index
    %c0_57 = arith.constant 0 : index
    %146 = vector.load %arg18[%c0_56, %c0_57] : memref<1x64xf32, #tpu.memory_space<vmem>>, vector<1x64xf32>
    %147 = vector.broadcast %146 : vector<1x64xf32> to vector<8x64xf32>
    %148 = arith.addf %145, %147 : vector<8x64xf32>
    %149 = arith.negf %143 : vector<8x64xf32>
    %150 = math.exp %149 : vector<8x64xf32>
    %cst_58 = arith.constant 1.000000e+00 : f32
    %151 = vector.broadcast %cst_58 : f32 to vector<8x64xf32>
    %152 = arith.addf %151, %150 : vector<8x64xf32>
    %153 = arith.divf %151, %152 : vector<8x64xf32>
    %154 = arith.mulf %143, %153 : vector<8x64xf32>
    %155 = arith.mulf %154, %148 : vector<8x64xf32>
    %156 = arith.truncf %155 : vector<8x64xf32> to vector<8x64xbf16>
    %c0_59 = arith.constant 0 : index
    %c0_60 = arith.constant 0 : index
    %157 = vector.load %arg19[%c0_59, %c0_60] : memref<64x32xbf16, #tpu.memory_space<vmem>>, vector<64x32xbf16>
    %cst_61 = arith.constant dense<0.000000e+00> : vector<8x32xf32>
    %158 = tpu.matmul %156, %157, %cst_61 {dimension_numbers = #tpu.dot_dimension_numbers<[1], [0], [0], [1], [0, 0, 1, 1], [], []>} : vector<8x64xbf16>, vector<64x32xbf16>, vector<8x32xf32> -> vector<8x32xf32>
    %159 = arith.addf %138, %158 : vector<8x32xf32>
    %c0_62 = arith.constant 0 : index
    %c0_63 = arith.constant 0 : index
    %160 = vector.load %arg20[%c0_62, %c0_63] : memref<1x32xf32, #tpu.memory_space<vmem>>, vector<1x32xf32>
    %161 = vector.broadcast %160 : vector<1x32xf32> to vector<8x32xf32>
    %162 = arith.addf %159, %161 : vector<8x32xf32>
    %163 = arith.addf %124, %162 : vector<8x32xf32>
    %c0_64 = arith.constant 0 : index
    %c0_65 = arith.constant 0 : index
    %c0_66 = arith.constant 0 : index
    %164 = vector.load %arg21[%c0_64, %c0_65, %c0_66] : memref<1x8x32xf32, #tpu.memory_space<vmem>>, vector<1x8x32xf32>
    %165 = vector.shape_cast %164 : vector<1x8x32xf32> to vector<8x32xf32>
    %166 = vector.shape_cast %163 : vector<8x32xf32> to vector<1x8x32xf32>
    tpu.vector_store %arg21[%c0_64, %c0_65, %c0_66], %166 {strides = array<i32>} : memref<1x8x32xf32, #tpu.memory_space<vmem>>, vector<1x8x32xf32>,
    return
  }
  func.func @transform_0(%arg0: i32) -> (i32, i32, i32) {
    %c0_i32 = arith.constant 0 : i32
    %c0_i32_0 = arith.constant 0 : i32
    %c0_i32_1 = arith.constant 0 : i32
    return %arg0, %c0_i32, %c0_i32_0 : i32, i32, i32
  }
  func.func @transform_1(%arg0: i32) -> (i32, i32) {
    %c0_i32 = arith.constant 0 : i32
    %c0_i32_0 = arith.constant 0 : i32
    %c0_i32_1 = arith.constant 0 : i32
    return %c0_i32, %c0_i32_0 : i32, i32
  }
  func.func @transform_2(%arg0: i32) -> (i32, i32) {
    %c0_i32 = arith.constant 0 : i32
    %c0_i32_0 = arith.constant 0 : i32
    %c0_i32_1 = arith.constant 0 : i32
    return %c0_i32, %c0_i32_0 : i32, i32
  }
  func.func @transform_3(%arg0: i32) -> (i32, i32) {
    %c0_i32 = arith.constant 0 : i32
    %c0_i32_0 = arith.constant 0 : i32
    %c0_i32_1 = arith.constant 0 : i32
    return %c0_i32, %c0_i32_0 : i32, i32
  }
  func.func @transform_4(%arg0: i32) -> (i32, i32) {
    %c0_i32 = arith.constant 0 : i32
    %c0_i32_0 = arith.constant 0 : i32
    %c0_i32_1 = arith.constant 0 : i32
    return %c0_i32, %c0_i32_0 : i32, i32
  }
  func.func @transform_5(%arg0: i32) -> (i32, i32) {
    %c0_i32 = arith.constant 0 : i32
    %c0_i32_0 = arith.constant 0 : i32
    %c0_i32_1 = arith.constant 0 : i32
    return %c0_i32, %c0_i32_0 : i32, i32
  }
  func.func @transform_6(%arg0: i32) -> (i32, i32) {
    %c0_i32 = arith.constant 0 : i32
    %c0_i32_0 = arith.constant 0 : i32
    %c0_i32_1 = arith.constant 0 : i32
    return %c0_i32, %c0_i32_0 : i32, i32
  }
  func.func @transform_7(%arg0: i32) -> (i32, i32) {
    %c0_i32 = arith.constant 0 : i32
    %c0_i32_0 = arith.constant 0 : i32
    %c0_i32_1 = arith.constant 0 : i32
    return %c0_i32, %c0_i32_0 : i32, i32
  }
  func.func @transform_8(%arg0: i32) -> (i32, i32) {
    %c0_i32 = arith.constant 0 : i32
    %c0_i32_0 = arith.constant 0 : i32
    %c0_i32_1 = arith.constant 0 : i32
    return %c0_i32, %c0_i32_0 : i32, i32
  }
  func.func @transform_9(%arg0: i32) -> (i32, i32) {
    %c0_i32 = arith.constant 0 : i32
    %c0_i32_0 = arith.constant 0 : i32
    %c0_i32_1 = arith.constant 0 : i32
    return %c0_i32, %c0_i32_0 : i32, i32
  }
  func.func @transform_10(%arg0: i32) -> (i32, i32) {
    %c0_i32 = arith.constant 0 : i32
    %c0_i32_0 = arith.constant 0 : i32
    %c0_i32_1 = arith.constant 0 : i32
    return %c0_i32, %c0_i32_0 : i32, i32
  }
  func.func @transform_11(%arg0: i32) -> (i32, i32) {
    %c0_i32 = arith.constant 0 : i32
    %c0_i32_0 = arith.constant 0 : i32
    %c0_i32_1 = arith.constant 0 : i32
    return %c0_i32, %c0_i32_0 : i32, i32
  }
  func.func @transform_12(%arg0: i32) -> (i32, i32) {
    %c0_i32 = arith.constant 0 : i32
    %c0_i32_0 = arith.constant 0 : i32
    %c0_i32_1 = arith.constant 0 : i32
    return %c0_i32, %c0_i32_0 : i32, i32
  }
  func.func @transform_13(%arg0: i32) -> (i32, i32) {
    %c0_i32 = arith.constant 0 : i32
    %c0_i32_0 = arith.constant 0 : i32
    %c0_i32_1 = arith.constant 0 : i32
    return %c0_i32, %c0_i32_0 : i32, i32
  }
  func.func @transform_14(%arg0: i32) -> (i32, i32) {
    %c0_i32 = arith.constant 0 : i32
    %c0_i32_0 = arith.constant 0 : i32
    %c0_i32_1 = arith.constant 0 : i32
    return %c0_i32, %c0_i32_0 : i32, i32
  }
  func.func @transform_15(%arg0: i32) -> (i32, i32) {
    %c0_i32 = arith.constant 0 : i32
    %c0_i32_0 = arith.constant 0 : i32
    %c0_i32_1 = arith.constant 0 : i32
    return %c0_i32, %c0_i32_0 : i32, i32
  }
  func.func @transform_16(%arg0: i32) -> (i32, i32) {
    %c0_i32 = arith.constant 0 : i32
    %c0_i32_0 = arith.constant 0 : i32
    %c0_i32_1 = arith.constant 0 : i32
    return %c0_i32, %c0_i32_0 : i32, i32
  }
  func.func @transform_17(%arg0: i32) -> (i32, i32) {
    %c0_i32 = arith.constant 0 : i32
    %c0_i32_0 = arith.constant 0 : i32
    %c0_i32_1 = arith.constant 0 : i32
    return %c0_i32, %c0_i32_0 : i32, i32
  }
  func.func @transform_18(%arg0: i32) -> (i32, i32) {
    %c0_i32 = arith.constant 0 : i32
    %c0_i32_0 = arith.constant 0 : i32
    %c0_i32_1 = arith.constant 0 : i32
    return %c0_i32, %c0_i32_0 : i32, i32
  }
  func.func @transform_19(%arg0: i32) -> (i32, i32) {
    %c0_i32 = arith.constant 0 : i32
    %c0_i32_0 = arith.constant 0 : i32
    %c0_i32_1 = arith.constant 0 : i32
    return %c0_i32, %c0_i32_0 : i32, i32
  }
  func.func @transform_20(%arg0: i32) -> (i32, i32, i32) {
    %c0_i32 = arith.constant 0 : i32
    %c0_i32_0 = arith.constant 0 : i32
    %c0_i32_1 = arith.constant 0 : i32
    return %arg0, %c0_i32, %c0_i32_0 : i32, i32, i32
  }
}

</mosaic_0001>

<bundles_post_ra>
// kernel: tpu_custom_call.1
= control target key start
LH: loop header
LB: loop body
LE: loop exit
PB: predicated region body
PF: predicated region fallthrough
CT: control target
= control target key end

     0   :  { %s3058_s0 = inlined_call_operand.vmem [shape: f32[2,8,32], index: 0, kind: input, shape index: {}]   ;;  %s3059_s1 = inlined_call_operand.hbm [shape: f32[1,32], index: 1, kind: input, shape index: {}]   ;;  %s3060_s2 = inlined_call_operand.vmem [shape: bf16[32,32], index: 2, kind: input, shape index: {}]   ;;  %s3061_s3 = inlined_call_operand.vmem [shape: f32[1,32], index: 3, kind: input, shape index: {}]   ;;  %s3062_s4 = inlined_call_operand.vmem [shape: bf16[32,32], index: 4, kind: input, shape index: {}]   ;;  %s3063_s5 = inlined_call_operand.hbm [shape: f32[1,32], index: 5, kind: input, shape index: {}]   ;;  %s3064_s6 = inlined_call_operand.hbm [shape: bf16[32,32], index: 6, kind: input, shape index: {}]   ;;  %s3065_s7 = inlined_call_operand.hbm [shape: f32[1,32], index: 7, kind: input, shape index: {}]   ;;  %s3066_s8 = inlined_call_operand.hbm [shape: bf16[32,32], index: 8, kind: input, shape index: {}]   ;;  %s3067_s9 = inlined_call_operand.hbm [shape: f32[1,32], index: 9, kind: input, shape index: {}]   ;;  %s3068_s10 = inlined_call_operand.hbm [shape: f32[8,32], index: 10, kind: input, shape index: {}]   ;;  %s3069_s11 = inlined_call_operand.hbm [shape: f32[8,32], index: 11, kind: input, shape index: {}]   ;;  %s3070_s12 = inlined_call_operand.hbm [shape: f32[8,32], index: 12, kind: input, shape index: {}]   ;;  %s3071_s13 = inlined_call_operand.hbm [shape: f32[8,32], index: 13, kind: input, shape index: {}]   ;;  %s3072_s14 = inlined_call_operand.hbm [shape: bf16[32,64], index: 14, kind: input, shape index: {}]   ;;  %s3073_s15 = inlined_call_operand.hbm [shape: f32[1,64], index: 15, kind: input, shape index: {}]   ;;  %s3074_s16 = inlined_call_operand.hbm [shape: bf16[32,64], index: 16, kind: input, shape index: {}]   ;;  %s3075_s17 = inlined_call_operand.hbm [shape: f32[1,64], index: 17, kind: input, shape index: {}]   ;;  %s3076_s18 = inlined_call_operand.vmem [shape: bf16[64,32], index: 18, kind: input, shape index: {}]   ;;  %s3077_s19 = inlined_call_operand.vmem [shape: f32[1,32], index: 19, kind: input, shape index: {}]   ;;  %s3078_s20 = inlined_call_operand.hbm [shape: f32[2,8,32], index: 20, kind: output, shape index: {}]  }
   0x1   :  { %3089 = sst [smem:[#allocation42_spill]] %s3058_s0 }
   0x2   :  { %3090 = sst [smem:[#allocation43_spill]] %s3059_s1 }
   0x3   :  { %3091 = sst [smem:[#allocation44_spill]] %s3060_s2 }
   0x4   :  { %3092 = sst [smem:[#allocation45_spill]] %s3061_s3 }
   0x5   :  { %3093 = sst [smem:[#allocation46_spill]] %s3062_s4 }
   0x6   :  { %3094 = sst [smem:[#allocation47_spill]] %s3063_s5 }
   0x7   :  { %3095 = sst [smem:[#allocation48_spill]] %s3064_s6 }
   0x8   :  { %3096 = sst [smem:[#allocation49_spill]] %s3065_s7 }
   0x9   :  { %3097 = sst [smem:[#allocation50_spill]] %s3067_s9 }
   0xa   :  { %25 = vsyncpa [#allocation3], 0 }
   0xb   :  { %26 = vsyncpa [#allocation6], 0 }
   0xc   :  { %27 = vsyncpa [#allocation9], 0 }
   0xd   :  { %28 = vsyncpa [#allocation12], 0 }
   0xe   :  { %29 = vsyncpa [#allocation15], 0 }
   0xf   :  { %30 = vsyncpa [#allocation18], 0 }
  0x10   :  { %31 = vsyncpa [#allocation21], 0 }
  0x11   :  { %32 = vsyncpa [#allocation24], 0 }
  0x12   :  { %33 = vsyncpa [#allocation4], 0 }
  0x13   :  { %35 = vsyncpa [#allocation4 + $0x1], 0  ;;  %s2736_s1 = smov 0   ;;  %s2738_s22 = smov 0  }
  0x14   :  { %s2740_s23 = smov 0   ;;  %s2742_s24 = smov 0  }
  0x15 LB: > { %3098 = sst [smem:[#allocation35_spill]] %s2591_s1  ;;  %s2757_s2 = sadd.s32 4294967295, %s2603_s24   ;;  %s2603_s24 = sphi %s2742_s24, %s3123_s24   ;;  %s2599_s23 = sphi %s2740_s23, %s3125_s23   ;;  %s2595_s22 = sphi %s2738_s22, %s3127_s22   ;;  %s2591_s1 = sphi %s2736_s1, %s3126_s1  }
  0x16   : > { %3099 = sst [smem:[#allocation36_spill]] %s2599_s23  ;;  %s1721_s25 = sadd.s32 4294967294, %s2603_s24  }
  0x17   : > { %3100 = sst [smem:[#allocation37_spill]] %s2603_s24  ;;  %s2761_s3 = sadd.s32 1, %s2603_s24  }
  0x18   : > { %3101 = sst [smem:[#allocation38_spill]] %s2761_s3  ;;  %s473_s26 = sadd.s32 1, %s2599_s23 }
  0x19   : > { %s470_s27 = ssub.s32 %s2603_s24, %s2761_s3  ;;  %p483_p0 = scmp.ne.s32.totalorder %s2599_s23, %s2595_s22 }
  0x1a   : > { %p471_p1 = scmp.eq.s32.totalorder %s470_s27, 0  ;;  %p484_p2 = scmp.eq.s32.totalorder %s2757_s2, 1 }
  0x1b   : > { %p489_p3 = scmp.ne.s32.totalorder %s2595_s22, %s2591_s1  ;;  %p490_p4 = scmp.eq.s32.totalorder %s1721_s25, 1 }
  0x1c   : > { %s2772_s28 = scalar_select %p471_p1, %s2599_s23, %s473_s26  }
  0x1d   : > { %p2774_p5 = por %p484_p2, %p483_p0  ;;  %p2778_p6 = por %p490_p4, %p489_p3 }
  0x1e   : > { %3102 = sst [smem:[#allocation39_spill]] %s2772_s28  ;;  %p1722_p7 = scmp.ge.s32.totalorder %s2603_s24, 1 }
  0x1f   : > { %s3103_s4 = scalar_select %p2774_p5, 1, 0 }
  0x20   : > { %s3105_s29 = scalar_select %p2778_p6, 1, 0 }
  0x21   : > { %3104 = sst [smem:[#allocation40_spill]] %s3103_s4  ;;  %p497_p8 = scmp.lt.s32.totalorder %s2603_s24, 3 }
  0x22   : > { %3106 = sst [smem:[#allocation41_spill]] %s3105_s29  ;;  %p1960_p9 = scmp.eq.s32.totalorder %s2757_s2, 0 }
  0x23   : > { %p2785_p10 = pnand %p1722_p7, %p497_p8  ;;  %s3108_s5 = sld [smem:[#allocation47_spill]] }
  0x24   : > { %s2605_s26 = smov [#allocation5]   ;;  %s3109_s7 = sld [smem:[#allocation49_spill]] }
  0x25   : > { %p1913_p11 = pneg %p2785_p10  ;;  %s532_s27 = sshll.u32 %s2605_s26, 4  ;;  %s533_s27 = int_to_ptr.vmem [resolvable:$true] %s532_s27 }
  0x26   : > { %s3111_s9 = sld [smem:[#allocation50_spill]]  ;;  %s2606_s1 = smov [#allocation8]  }
  0x27   : > { %p2799_p12 = pnand %p1960_p9, %p1913_p11  ;;  %s558_s26 = sshll.u32 %s2606_s1, 4  ;;  %s559_s26 = int_to_ptr.vmem [resolvable:$true] %s558_s26 }
  0x28   : > { %s2607_s24 = smov [#allocation11]   ;;  %s2608_s0 = smov [#allocation14]  }
  0x29   : > { %s530_s25 = sshll.u32 %s3108_s5, 4  ;;  %s584_s4 = sshll.u32 %s2607_s24, 4  ;;  %s531_s25 = int_to_ptr.hbm [resolvable:$true] %s530_s25  ;;  %s585_s4 = int_to_ptr.vmem [resolvable:$true] %s584_s4 }
  0x2a   : > { %s556_s3 = sshll.u32 %s3109_s7, 4  ;;  %s606_s7 = sshll.u32 %s3069_s11, 4  ;;  %s557_s3 = int_to_ptr.hbm [resolvable:$true] %s556_s3  ;;  %s607_s7 = int_to_ptr.hbm [resolvable:$true] %s606_s7 }
  0x2b   : > { %1919 = dma.hbm_to_vmem [thread:$0]  (!%p2799_p12), %s531_s25, 16, %s533_s27, [#allocation6]  }
  0x2c   : > { %s582_s5 = sshll.u32 %s3111_s9, 4  ;;  %s608_s1 = sshll.u32 %s2608_s0, 4  ;;  %s583_s5 = int_to_ptr.hbm [resolvable:$true] %s582_s5  ;;  %s609_s1 = int_to_ptr.vmem [resolvable:$true] %s608_s1 }
  0x2d   : > { %1925 = dma.hbm_to_vmem [thread:$0]  (!%p2799_p12), %s557_s3, 16, %s559_s26, [#allocation9]  }
  0x2e   : > { %1931 = dma.hbm_to_vmem [thread:$0]  (!%p2799_p12), %s583_s5, 16, %s585_s4, [#allocation12]  }
  0x2f   : > { %s630_s25 = sshll.u32 %s3071_s13, 4  ;;  %s656_s26 = sshll.u32 %s3073_s15, 4  ;;  %s631_s25 = int_to_ptr.hbm [resolvable:$true] %s630_s25  ;;  %s657_s26 = int_to_ptr.hbm [resolvable:$true] %s656_s26 }
  0x30   : > { %1937 = dma.hbm_to_vmem [thread:$0]  (!%p2799_p12), %s607_s7, 128, %s609_s1, [#allocation15]  }
  0x31   : > { %s2609_s24 = smov [#allocation17]   ;;  %s2610_s5 = smov [#allocation20]  }
  0x32   : > { %s632_s23 = sshll.u32 %s2609_s24, 4  ;;  %s658_s4 = sshll.u32 %s2610_s5, 4  ;;  %s633_s23 = int_to_ptr.vmem [resolvable:$true] %s632_s23  ;;  %s659_s4 = int_to_ptr.vmem [resolvable:$true] %s658_s4 }
  0x33   : > { %1943 = dma.hbm_to_vmem [thread:$0]  (!%p2799_p12), %s631_s25, 128, %s633_s23, [#allocation18]  }
  0x34   : > { %s3112_s0 = sld [smem:[#allocation43_spill]]  ;;  %s2611_s27 = smov [#allocation2]  }
  0x35   : > { %1949 = dma.hbm_to_vmem [thread:$0]  (!%p2799_p12), %s657_s26, 16, %s659_s4, [#allocation21]  }
  0x36   : > { %s3113_s6 = sld [smem:[#allocation48_spill]]  ;;  %s511_s24 = sshll.u32 %s2611_s27, 4  ;;  %s512_s24 = int_to_ptr.vmem [resolvable:$true] %s511_s24 }
  0x37   : > { %s2612_s25 = smov [#allocation7]   ;;  %s2613_s5 = smov 64  }
  0x38   : > { %s543_s23 = sshll.u32 %s2612_s25, 4  ;;  %s2614_s9 = smov 4   ;;  %s544_s23 = int_to_ptr.vmem [resolvable:$true] %s543_s23 }
  0x39   : > { %s567_s28 = sshll.u32 %s3066_s8, 4  ;;  %s594_s27 = sshll.u32 %s3068_s10, 4  ;;  %s568_s28 = int_to_ptr.hbm [resolvable:$true] %s567_s28  ;;  %s595_s27 = int_to_ptr.hbm [resolvable:$true] %s594_s27 }
  0x3a   : > { %s509_s21 = sshll.u32 %s3112_s0, 4  ;;  %s2615_s0 = smov [#allocation10]   ;;  %s510_s21 = int_to_ptr.hbm [resolvable:$true] %s509_s21 }
  0x3b   : > { %1916 = dma.hbm_to_vmem [thread:$0]  (!%p2799_p12), %s510_s21, 16, %s512_s24, [#allocation3]  }
  0x3c   : > { %s541_s3 = sshll.u32 %s3113_s6, 4  ;;  %s569_s7 = sshll.u32 %s2615_s0, 4  ;;  %s542_s3 = int_to_ptr.hbm [resolvable:$true] %s541_s3  ;;  %s570_s7 = int_to_ptr.vmem [resolvable:$true] %s569_s7 }
  0x3d   : > { %1922 = dma.hbm_to_vmem [thread:$0]  (!%p2799_p12), %s542_s3, 256, %s544_s23, [#allocation6], %s2613_s5, %s2613_s5, %s2614_s9  }
  0x3e   : > { %1928 = dma.hbm_to_vmem [thread:$0]  (!%p2799_p12), %s568_s28, 256, %s570_s7, [#allocation9], %s2613_s5, %s2613_s5, %s2614_s9  }
  0x3f   : > { %s2616_s3 = smov [#allocation13]   ;;  %s618_s26 = sshll.u32 %s3070_s12, 4  ;;  %s619_s26 = int_to_ptr.hbm [resolvable:$true] %s618_s26 }
  0x40   : > { %s596_s24 = sshll.u32 %s2616_s3, 4  ;;  %s641_s21 = sshll.u32 %s3072_s14, 4  ;;  %s597_s24 = int_to_ptr.vmem [resolvable:$true] %s596_s24  ;;  %s642_s21 = int_to_ptr.hbm [resolvable:$true] %s641_s21 }
  0x41   : > { %1934 = dma.hbm_to_vmem [thread:$0]  (!%p2799_p12), %s595_s27, 128, %s597_s24, [#allocation12]  }
  0x42   : > { %s2617_s1 = smov [#allocation16]   ;;  %s2618_s28 = smov [#allocation19]  }
  0x43   : > { %s620_s6 = sshll.u32 %s2617_s1, 4  ;;  %s643_s7 = sshll.u32 %s2618_s28, 4  ;;  %s621_s6 = int_to_ptr.vmem [resolvable:$true] %s620_s6  ;;  %s644_s7 = int_to_ptr.vmem [resolvable:$true] %s643_s7 }
  0x44   : > { %1940 = dma.hbm_to_vmem [thread:$0]  (!%p2799_p12), %s619_s26, 128, %s621_s6, [#allocation15]  }
  0x45   : > { %s667_s23 = sshll.u32 %s3074_s16, 4  ;;  %s682_s4 = sshll.u32 %s3075_s17, 4  ;;  %s668_s23 = int_to_ptr.hbm [resolvable:$true] %s667_s23  ;;  %s683_s4 = int_to_ptr.hbm [resolvable:$true] %s682_s4 }
  0x46   : > { %1946 = dma.hbm_to_vmem [thread:$0]  (!%p2799_p12), %s642_s21, 256, %s644_s7, [#allocation18], %s2613_s5, %s2613_s5, %s2614_s9  }
  0x47   : > { %s2619_s0 = smov [#allocation22]   ;;  %s2620_s26 = smov [#allocation23]  }
  0x48   : > { %s669_s6 = sshll.u32 %s2619_s0, 4  ;;  %s684_s1 = sshll.u32 %s2620_s26, 4  ;;  %s670_s6 = int_to_ptr.vmem [resolvable:$true] %s669_s6  ;;  %s685_s1 = int_to_ptr.vmem [resolvable:$true] %s684_s1 }
  0x49   : > { %1952 = dma.hbm_to_vmem [thread:$0]  (!%p2799_p12), %s668_s23, 256, %s670_s6, [#allocation21], %s2613_s5, %s2613_s5, %s2614_s9  }
  0x4a   : > { %1955 = dma.hbm_to_vmem [thread:$0]  (!%p2799_p12), %s683_s4, 16, %s685_s1, [#allocation24]  }
  0x4b   : > { %710 = sbr.rel (%p2785_p10) target bundleno = 1961 (0x7a9), region = 100 }
  0x50   : > { %2554 = dma.done.wait (%p1960_p9), [#allocation3], 16  }
  0x51   : > { %2556 = vsyncadd (%p1960_p9), [#allocation3], 4294967280 }
  0x52   : > { %2558 = dma.done.wait (%p1960_p9), [#allocation6], 272  }
  0x53   : > { %2560 = vsyncadd (%p1960_p9), [#allocation6], 4294967024 }
  0x54   : > { %2562 = dma.done.wait (%p1960_p9), [#allocation9], 272  }
  0x55   : > { %2564 = vsyncadd (%p1960_p9), [#allocation9], 4294967024 }
  0x56   : > { %2566 = dma.done.wait (%p1960_p9), [#allocation12], 144  }
  0x57   : > { %2568 = vsyncadd (%p1960_p9), [#allocation12], 4294967152 }
  0x58   : > { %2570 = dma.done.wait (%p1960_p9), [#allocation15], 256  }
  0x59   : > { %2572 = vsyncadd (%p1960_p9), [#allocation15], 4294967040 }
  0x5a   : > { %2574 = dma.done.wait (%p1960_p9), [#allocation18], 384  }
  0x5b   : > { %2576 = vsyncadd (%p1960_p9), [#allocation18], 4294966912 }
  0x5c   : > { %2578 = dma.done.wait (%p1960_p9), [#allocation21], 272  }
  0x5d   : > { %2580 = vsyncadd (%p1960_p9), [#allocation21], 4294967024 }
  0x5e   : > { %2582 = dma.done.wait (%p1960_p9), [#allocation24], 16  }
  0x5f   : > { %2584 = vsyncadd (%p1960_p9), [#allocation24], 4294967280  ;;  %p833_p13 = scmp.lt.s32.totalorder %s2757_s2, 1  ;;  %s3114_s21 = sld [smem:[#allocation42_spill]]  ;;  %vm841_vm0 = vcmask 261120   ;;  %v2621_v3 = vmov 32.0  }
  0x60   : > { %2055 = vrcp.f32 %v2621_v3  ;;  %s3115_s25 = sld [smem:[#allocation44_spill]]  ;;  %v1844_v9 = vld [vmem:[#allocation7 + $0x8] sm:$0xff]  ;;  %v1843_v13 = vld [vmem:[#allocation7] sm:$0xff]  ;;  %v2938_v25 = vld [vmem:[#allocation2] ss:$0 sm:$0xff]  ;;  %vm974_vm5 = vcmask 1047808  }
  0x61   : > { %s834_s29 = scalar_select %p833_p13, %s2757_s2, 1  ;;  %965 = vmatpush.bf16.msra.mxu2 %v1844_v9  ;;  %v993_v30 = vld [vmem:[#allocation17] sm:$0xff]  ;;  %v973_v45 = vld [vmem:[#allocation14] sm:$0xff]  ;;  %v992_v55 = vld [vmem:[#allocation16] sm:$0xff]  ;;  %vm1053_vm6 = vcmask 64512   ;;  %vm1204_vm7 = vcmask 1043456  }
  0x62   : > { %s3116_s24 = sld [smem:[#allocation46_spill]]  ;;  %v2049_v32 = vld [vmem:[#allocation5] ss:$0 sm:$0xff]  ;;  %v2050_v54 = vld [vmem:[#allocation8] ss:$0 sm:$0xff]  ;;  %s2625_s7 = smov 104  }
  0x63   : > { %s1754_s30 = sshll.u32 %s834_s29, 3  ;;  %s2622_s29 = smov 1   ;;  %vm1303_vm9 = vcmask 130048   ;;  %vm1305_vm10 = vcmask 195584  }
  0x64   : > { %1002 = vrot.lane.b32.xlu2 %v993_v30, %s2622_s29  ;;  %s3118_s9 = sld [smem:[#allocation45_spill]]  ;;  %s2626_s3 = smov 120  }
  0x65   : > { %s836_s28 = scalar_lea.vmem %s3114_s21, %s1754_s30  ;;  %966 = vmatpush.bf16.msra.mxu2 %v1843_v13  ;;  %s2623_s21 = smov 32  }
  0x66   : > { %v2918_v0 = vld [vmem:[%s836_s28] sm:$0xff]  ;;  %v2056_v4 = vpop.eup %2055  ;;  %v1840_v7 = vld [vmem:[%s3115_s25 + $0x8] sm:$0xff]  ;;  %s2624_s28 = smov 127   ;;  %s2627_s23 = smov 112  }
  0x67   : > { %v840_v1 = vmul.f32 %v2918_v0, %v2918_v0  ;;  %v846_v5 = vmul.f32 32.0, %v2056_v4  ;;  %899 = vmatpush.bf16.msra.mxu0 %v1840_v7  ;;  %v1839_v11 = vld [vmem:[%s3115_s25] sm:$0xff]  ;;  %vm850_vm1 = vweird.f32 %v2056_v4  ;;  %s2628_s27 = smov 24   ;;  %s2630_s0 = smov 8  }
  0x68   : > { %s3117_s4 = smov %s3116_s24  ;;  %v1842_v8 = vld [vmem:[%s3116_s24 + $0x8] sm:$0xff]  ;;  %s2629_s24 = smov 16  }
  0x69   : > { %v842_v2 = vsel %vm841_vm0, %v840_v1, 0.0  ;;  %v847_v6 = vsub.f32 1.0, %v846_v5  ;;  %932 = vmatpush.bf16.msra.mxu1 %v1842_v8  ;;  %v1841_v12 = vld [vmem:[%s3117_s4] sm:$0xff]  ;;  %v972_v1 = vld [vmem:[#allocation13] sm:$0xff] }
  0x6a   : > { %843 = vadd.xlane.f32.xlu0 %v842_v2  ;;  %v2048_v31 = vld [vmem:[%s3118_s9] ss:$0 sm:$0xff] }
  0x6b   : > { %v848_v10 = vmul.f32 %v2056_v4, %v847_v6  ;;  %900 = vmatpush.bf16.msra.mxu0 %v1839_v11 }
  0x6d   : > { %v849_v14 = vadd.f32 %v2056_v4, %v848_v10  ;;  %933 = vmatpush.bf16.msra.mxu1 %v1841_v12 }
  0x6f   : > { %v2935_v15 = vsel %vm850_vm1, %v2056_v4, %v849_v14 }
  0xbe   : > { %v1003_v46 = vpop.permute.xlu2 %1002 }
  0xdd   : > { %v844_v16 = vpop.xlane.xlu0 %843 }
  0xde   : > { %v852_v17 = vmul.f32 %v2935_v15, %v844_v16 }
  0xe0   : > { %v853_v18 = vadd.f32 1e-08, %v852_v17 }
  0xe2   : > { %2057 = vrsqrt.f32 %v853_v18  ;;  %vm860_vm3 = vweird.f32 %v853_v18 }
  0xe8   : > { %v2058_v19 = vpop.eup %2057 }
  0xe9   : > { %v855_v20 = vmul.f32 %v2058_v19, %v853_v18  ;;  %vm861_vm2 = vweird.f32 %v2058_v19 }
  0xea   : > { %vm862_vm4 = vmor %vm860_vm3, %vm861_vm2  ;;  %vm1491_vm3 = vcmask 523264  }
  0xeb   : > { %v856_v21 = vmul.f32 %v2058_v19, %v855_v20 }
  0xed   : > { %v857_v22 = vmul.f32 0.5, %v856_v21 }
  0xef   : > { %v858_v23 = vsub.f32 1.5, %v857_v22 }
  0xf1   : > { %v859_v24 = vmul.f32 %v2058_v19, %v858_v23 }
  0xf3   : > { %v863_v26 = vsel %vm862_vm4, %v2058_v19, %v859_v24  ;;  %v1130_v24 = vlaneseq }
  0xf4   : > { %v864_v27 = vmul.f32 %v863_v26, %v2918_v0 }
  0xf5   : > { %v1131_v26 = vshrl.u32 %v1130_v24, 7 }
  0xf6   : > { %v868_v28 = vmul.f32 %v2938_v25, %v864_v27  ;;  %v1133_v27 = vand.u32 127, %v1130_v24 }
  0xf8   : > { %v869_v29 = vpack.c.bf16 %v868_v28, %v868_v28  ;;  %vm1134_vm8 = vcmp.ge.s32.totalorder %v1131_v26, %v1133_v27 }
  0xfa   : > { %1763 = vmatmul.msk.bf16.vlgmr.msra.gmra.mxu0 %vm841_vm0, %v869_v29  ;;  %1772 = vmatmul.msk.bf16.vlgmr.msra.gmra.mxu1 %vm841_vm0, %v869_v29 }
  0xfb   : > { %1781 = vmatmul.msk.bf16.vlgmr.msra.gmra.mxu2 %vm841_vm0, %v869_v29 }
 0x177   : > { %v902_v33 = vpop.f32.mrf.mxu0  ;;  %v935_v34 = vpop.f32.mrf.mxu1 }
 0x178   : > { %v903_v35 = vadd.f32 %v2048_v31, %v902_v33  ;;  %v936_v36 = vadd.f32 %v2049_v32, %v935_v34 }
 0x17a   : > { %994 = vrot.lane.b32.xlu0 %v936_v36, %s2623_s21  ;;  %975 = vrot.lane.b32.xlu1 %v903_v35, %s2623_s21  ;;  %v1000_v57 = vmul.f32 %v992_v55, %v936_v36  ;;  %v981_v2 = vmul.f32 %v972_v1, %v903_v35 }
 0x17e   : > { %v968_v37 = vpop.f32.mrf.mxu2 }
 0x17f   : > { %v904_v38 = vpop.f32.mrf.mxu0  ;;  %v937_v39 = vpop.f32.mrf.mxu1  ;;  %v2952_v56 = vadd.f32 %v2050_v54, %v968_v37 }
 0x181   : > { %v1049_v60 = vpack.c.bf16 %v2952_v56, %v2952_v56 }
 0x183   : > { %v1206_v63 = vsel %vm1204_vm7, %v1049_v60, 0 }
 0x186   : > { %v970_v40 = vpop.f32.mrf.mxu2 }
 0x1ec   : > { %v995_v41 = vpop.permute.xlu0 %994  ;;  %v976_v42 = vpop.permute.xlu1 %975 }
 0x1ed   : > { %v996_v43 = vsel %vm974_vm5, %v995_v41, %v936_v36  ;;  %v977_v44 = vsel %vm974_vm5, %v976_v42, %v903_v35 }
 0x1ee   : > { %997 = vrot.lane.b32.xlu1 %v996_v43, %s2623_s21  ;;  %978 = vrot.lane.b32.xlu2 %v977_v44, %s2623_s21 }
 0x1f6   : > { %983 = vrot.lane.b32.xlu1 %v973_v45, %s2622_s29 }
 0x248   : > { %v979_v50 = vpop.permute.xlu2 %978 }
 0x249   : > { %v980_v51 = vsel %vm974_vm5, %v979_v50, %v903_v35 }
 0x260   : > { %v998_v47 = vpop.permute.xlu1 %997 }
 0x261   : > { %v999_v48 = vsel %vm974_vm5, %v998_v47, %v936_v36 }
 0x262   : > { %v1005_v49 = vmul.f32 %v1003_v46, %v999_v48 }
 0x264   : > { %1007 = vrot.lane.b32.xlu2 %v1005_v49, %s2624_s28 }
 0x268   : > { %v984_v52 = vpop.permute.xlu1 %983 }
 0x269   : > { %v986_v53 = vmul.f32 %v984_v52, %v980_v51 }
 0x26b   : > { %988 = vrot.lane.b32.xlu1 %v986_v53, %s2624_s28  ;;  %s830_s28 = sand.u32 1, %s2595_s22  }
 0x2be   : > { %v1008_v58 = vpop.permute.xlu2 %1007 }
 0x2bf   : > { %v1010_v59 = vadd.f32 %v1008_v58, %v1000_v57 }
 0x2c1   : > { %1032 = vrot.lane.b32.xlu2 %v1010_v59, %s2625_s7  ;;  %1026 = vrot.lane.b32.xlu1 %v1010_v59, %s2626_s3  ;;  %v1035_v61 = vpack.c.bf16 %v1010_v59, %v1010_v59 }
 0x2c3   : > { %v1058_v62 = vsel %vm1053_vm6, %v1035_v61, 0 }
 0x2c4   : > { %1067 = vmatpush.bf16.xpose.msra.mxu3 %v1058_v62 }
 0x2c9   : > { %1029 = vrot.lane.b32.xlu2 %v1010_v59, %s2627_s23 }
 0x2cc   : > { %1215 = vmatpush.bf16.msrb.mxu3 %v1206_v63 }
 0x2dd   : > { %v989_v3 = vpop.permute.xlu1 %988 }
 0x2de   : > { %v991_v4 = vadd.f32 %v989_v3, %v981_v2 }
 0x2e0   : > { %1015 = vrot.lane.b32.xlu1 %v991_v4, %s2627_s23  ;;  %1018 = vrot.lane.b32.xlu0 %v991_v4, %s2625_s7  ;;  %v1021_v5 = vpack.c.bf16 %v991_v4, %v991_v4 }
 0x2e2   : > { %1782 = vmatmul.msk.bf16.vlgmr.msra.gmra.mxu3 %vm1053_vm6, %v1021_v5 }
 0x2e8   : > { %1012 = vrot.lane.b32.xlu0 %v991_v4, %s2626_s3 }
 0x31b   : > { %v1033_v6 = vpop.permute.xlu2 %1032 }
 0x31c   : > { %v1038_v7 = vpack.c.bf16 %v1033_v6, %v1033_v6 }
 0x31e   : > { %v1115_v8 = vsel %vm1053_vm6, %v1038_v7, 0 }
 0x31f   : > { %1124 = vmatpush.bf16.xpose.msrb.mxu2 %v1115_v8 }
 0x323   : > { %v1030_v9 = vpop.permute.xlu2 %1029 }
 0x324   : > { %v1037_v10 = vpack.c.bf16 %v1030_v9, %v1030_v9 }
 0x326   : > { %v1096_v11 = vsel %vm1053_vm6, %v1037_v10, 0 }
 0x327   : > { %1105 = vmatpush.bf16.xpose.msrb.mxu1 %v1096_v11 }
 0x333   : > { %v1027_v12 = vpop.permute.xlu1 %1026 }
 0x334   : > { %v1036_v13 = vpack.c.bf16 %v1027_v12, %v1027_v12 }
 0x336   : > { %v1077_v14 = vsel %vm1053_vm6, %v1036_v13, 0 }
 0x337   : > { %1086 = vmatpush.bf16.xpose.msrb.mxu0 %v1077_v14 }
 0x352   : > { %v1016_v16 = vpop.permute.xlu1 %1015  ;;  %v1019_v17 = vpop.permute.xlu0 %1018 }
 0x353   : > { %v1023_v18 = vpack.c.bf16 %v1016_v16, %v1016_v16  ;;  %v1024_v19 = vpack.c.bf16 %v1019_v17, %v1019_v17 }
 0x355   : > { %1784 = vmatmul.msk.bf16.vlgmr.msrb.gmra.mxu1 %vm1053_vm6, %v1023_v18  ;;  %1785 = vmatmul.msk.bf16.vlgmr.msrb.gmra.mxu2 %vm1053_vm6, %v1024_v19 }
 0x35a   : > { %v1013_v20 = vpop.permute.xlu0 %1012 }
 0x35b   : > { %v1022_v21 = vpack.c.bf16 %v1013_v20, %v1013_v20 }
 0x35d   : > { %1783 = vmatmul.msk.bf16.vlgmr.msrb.gmra.mxu0 %vm1053_vm6, %v1022_v21 }
 0x365   : > { %v1069_v22 = vpop.f32.mrf.mxu3 }
 0x366   : > { %v1137_v40 = vsel %vm1134_vm8, %v1069_v22, -1e+30 }
 0x367   : > { %v1141_v41 = vsel %vm1053_vm6, %v1137_v40, -inf }
 0x36d   : > { %v1071_v23 = vpop.f32.mrf.mxu3 }
 0x3d2   : > { %v1107_v28 = vpop.f32.mrf.mxu1 }
 0x3d3   : > { %v1139_v29 = vsel %vm1134_vm8, %v1107_v28, -1e+30 }
 0x3d4   : > { %v1147_v30 = vsel %vm1053_vm6, %v1139_v29, -inf }
 0x3d5   : > { %1148 = vmax.xlane.f32.xlu1 %v1147_v30 }
 0x3d8   : > { %v1126_v31 = vpop.f32.mrf.mxu2 }
 0x3d9   : > { %v1140_v32 = vsel %vm1134_vm8, %v1126_v31, -1e+30 }
 0x3da   : > { %v1088_v33 = vpop.f32.mrf.mxu0  ;;  %v1109_v34 = vpop.f32.mrf.mxu1  ;;  %v1150_v35 = vsel %vm1053_vm6, %v1140_v32, -inf }
 0x3db   : > { %v1138_v36 = vsel %vm1134_vm8, %v1088_v33, -1e+30  ;;  %1151 = vmax.xlane.f32.xlu2 %v1150_v35 }
 0x3dc   : > { %v1144_v37 = vsel %vm1053_vm6, %v1138_v36, -inf }
 0x3dd   : > { %1145 = vmax.xlane.f32.xlu0 %v1144_v37 }
 0x3e0   : > { %v1128_v38 = vpop.f32.mrf.mxu2 }
 0x3e2   : > { %v1090_v39 = vpop.f32.mrf.mxu0 }
 0x3ee   : > { %1043 = vrot.lane.b32.xlu1 %v2952_v56, %s2627_s23 }
 0x3f1   : > { %1040 = vrot.lane.b32.xlu0 %v2952_v56, %s2626_s3  ;;  %s1836_s3 = sshll.u32 %s2757_s2, 3  ;;  %s1511_s2 = scalar_lea.sflag [#allocation4], %s830_s28 }
 0x3f2   : > { %s1521_s26 = scalar_lea.hbm %s3078_s20, %s1836_s3 }
 0x3f3   : > { %1046 = vrot.lane.b32.xlu2 %v2952_v56, %s2625_s7  ;;  %s1753_s7 = sshll.u32 %s830_s28, 3  ;;  %s1525_s30 = sshll.u32 %s1521_s26, 4  ;;  %s1526_s30 = int_to_ptr.hbm [resolvable:$true] %s1525_s30 }
 0x3f4   : > { %s832_s1 = scalar_lea.vmem [#allocation25], %s1753_s7  ;;  %s2523_s5 = sshra.s32 %s1526_s30, 4  ;;  %s2524_s5 = int_to_ptr.hbm [resolvable:$true] %s2523_s5 }
 0x3f5   : > { %s1523_s29 = sshll.u32 %s832_s1, 4  ;;  %s2525_s9 = scalar_lea.hbm %s2524_s5, 8  ;;  %s1524_s29 = int_to_ptr.vmem [resolvable:$true] %s1523_s29 }
 0x3f6   : > { %p2526_p0 = scmp.ne.s32.totalorder %s2524_s5, %s2525_s9  ;;  %s2529_s7 = scalar_lea.hbm %s3078_s20, 16 }
 0x3f7   : > { %p2530_p3 = scmp.lt.s32.totalorder %s2524_s5, %s3078_s20  ;;  %p2531_p4 = scmp.lt.s32.totalorder %s2529_s7, %s2525_s9 }
 0x3f8   : > { %p2527_p1 = pnand %p2526_p0, %p2774_p5 }
 0x3f9   : > { %p2532_p7 = por %p2531_p4, %p2530_p3 }
 0x3fa   : > { %p2528_p2 = pneg %p2527_p1 }
 0x3fc   : > { %p2533_p8 = pnand %p2532_p7, %p2528_p2 }
 0x41c   : > { %1142 = vmax.xlane.f32.xlu2 %v1141_v41 }
 0x448   : > { %v1149_v42 = vpop.xlane.xlu1 %1148 }
 0x449   : > { %v1167_v43 = vsub.f32 %v1139_v29, %v1149_v42  ;;  %v1155_v13 = vsub.f32 -inf, %v1149_v42 }
 0x44b   : > { %v1173_v44 = vmul.f32 1.442695, %v1167_v43  ;;  %v1161_v17 = vmul.f32 1.442695, %v1155_v13  ;;  %v1847_v13 = vld [vmem:[#allocation19] sm:$0xff] }
 0x44d   : > { %2059 = vpow2.f32 %v1173_v44 }
 0x44e   : > { %v1152_v45 = vpop.xlane.xlu2 %1151 }
 0x44f   : > { %v1168_v46 = vsub.f32 %v1140_v32, %v1152_v45  ;;  %v1156_v12 = vsub.f32 -inf, %v1152_v45 }
 0x450   : > { %v1146_v47 = vpop.xlane.xlu0 %1145 }
 0x451   : > { %v1175_v48 = vmul.f32 1.442695, %v1168_v46  ;;  %v1166_v49 = vsub.f32 %v1138_v36, %v1146_v47  ;;  %v1163_v14 = vmul.f32 1.442695, %v1156_v12  ;;  %v1154_v16 = vsub.f32 -inf, %v1146_v47  ;;  %v1850_v12 = vld [vmem:[#allocation22 + $0x8] sm:$0xff] }
 0x453   : > { %v1171_v50 = vmul.f32 1.442695, %v1166_v49  ;;  %v2060_v51 = vpop.eup %2059  ;;  %2061 = vpow2.f32 %v1175_v48  ;;  %v1159_v18 = vmul.f32 1.442695, %v1154_v16  ;;  %v1846_v49 = vld [vmem:[#allocation10 + $0x8] sm:$0xff] }
 0x454   : > { %v1187_v52 = vsel %vm1053_vm6, %v2060_v51, 0.0  ;;  %v1199_v3 = vpack.c.bf16 %v2060_v51, %v2060_v51  ;;  %1337 = vmatpush.bf16.msra.mxu3 %v1846_v49  ;;  %v1845_v51 = vld [vmem:[#allocation10] sm:$0xff] }
 0x455   : > { %2063 = vpow2.f32 %v1171_v50  ;;  %1188 = vadd.xlane.f32.xlu1 %v1187_v52 }
 0x456   : > { %v1047_v53 = vpop.permute.xlu2 %1046 }
 0x457   : > { %v1052_v54 = vpack.c.bf16 %v1047_v53, %v1047_v53 }
 0x458   : > { %1338 = vmatpush.bf16.msra.mxu3 %v1845_v51 }
 0x459   : > { %v1263_v55 = vsel %vm1204_vm7, %v1052_v54, 0  ;;  %v2062_v56 = vpop.eup %2061 }
 0x45a   : > { %1272 = vmatpush.bf16.msra.mxu2 %v1263_v55  ;;  %v1200_v57 = vpack.c.bf16 %v2062_v56, %v2062_v56  ;;  %v1190_v58 = vsel %vm1053_vm6, %v2062_v56, 0.0 }
 0x45b   : > { %v2064_v59 = vpop.eup %2063  ;;  %1191 = vadd.xlane.f32.xlu2 %v1190_v58 }
 0x45c   : > { %v1184_v60 = vsel %vm1053_vm6, %v2064_v59, 0.0  ;;  %v1198_v5 = vpack.c.bf16 %v2064_v59, %v2064_v59 }
 0x45d   : > { %1789 = vmatmul.msk.bf16.vlgmr.msra.gmra.mxu2 %vm1053_vm6, %v1200_v57  ;;  %1185 = vadd.xlane.f32.xlu0 %v1184_v60 }
 0x460   : > { %v1044_v61 = vpop.permute.xlu1 %1043 }
 0x461   : > { %v1051_v62 = vpack.c.bf16 %v1044_v61, %v1044_v61 }
 0x463   : > { %v1244_v63 = vsel %vm1204_vm7, %v1051_v62, 0  ;;  %v1041_v1 = vpop.permute.xlu0 %1040 }
 0x464   : > { %v1050_v2 = vpack.c.bf16 %v1041_v1, %v1041_v1  ;;  %1253 = vmatpush.bf16.msra.mxu1 %v1244_v63 }
 0x466   : > { %v1225_v4 = vsel %vm1204_vm7, %v1050_v2, 0 }
 0x467   : > { %1234 = vmatpush.bf16.msra.mxu0 %v1225_v4  ;;  %1788 = vmatmul.msk.bf16.vlgmr.msra.gmra.mxu1 %vm1053_vm6, %v1199_v3  ;;  %v2051_v4 = vld [vmem:[#allocation11] ss:$0 sm:$0xff] }
 0x468   : > { %1426 = vmatpush.bf16.msrb.mxu1 %v1850_v12 }
 0x46a   : > { %1787 = vmatmul.msk.bf16.vlgmr.msra.gmra.mxu0 %vm1053_vm6, %v1198_v5 }
 0x48f   : > { %v1143_v6 = vpop.xlane.xlu2 %1142 }
 0x490   : > { %v1165_v7 = vsub.f32 %v1137_v40, %v1143_v6  ;;  %v1153_v50 = vsub.f32 -inf, %v1143_v6 }
 0x492   : > { %v1169_v8 = vmul.f32 1.442695, %v1165_v7  ;;  %v1157_v52 = vmul.f32 1.442695, %v1153_v50 }
 0x494   : > { %2065 = vpow2.f32 %v1169_v8 }
 0x495   : > { %2067 = vpow2.f32 %v1163_v14  ;;  %v1849_v14 = vld [vmem:[#allocation22] sm:$0xff] }
 0x496   : > { %2069 = vpow2.f32 %v1161_v17  ;;  %1427 = vmatpush.bf16.msrb.mxu1 %v1849_v14 }
 0x497   : > { %2071 = vpow2.f32 %v1159_v18 }
 0x49a   : > { %v2066_v9 = vpop.eup %2065 }
 0x49b   : > { %v1181_v10 = vsel %vm1053_vm6, %v2066_v9, 0.0  ;;  %v1197_v11 = vpack.c.bf16 %v2066_v9, %v2066_v9  ;;  %v2068_v19 = vpop.eup %2067 }
 0x49c   : > { %1182 = vadd.xlane.f32.xlu0 %v1181_v10  ;;  %v1180_v21 = vmul.f32 0.0, %v2068_v19  ;;  %v2070_v22 = vpop.eup %2069 }
 0x49d   : > { %1786 = vmatmul.msk.bf16.vlgmr.msrb.gmra.mxu3 %vm1053_vm6, %v1197_v11  ;;  %v2072_v26 = vpop.eup %2071  ;;  %v1179_v27 = vmul.f32 0.0, %v2070_v22  ;;  %v1848_v11 = vld [vmem:[#allocation19 + $0x8] sm:$0xff] }
 0x49e   : > { %v1178_v30 = vmul.f32 0.0, %v2072_v26  ;;  %1393 = vmatpush.bf16.msrb.mxu0 %v1848_v11 }
 0x4a2   : > { %1394 = vmatpush.bf16.msrb.mxu0 %v1847_v13 }
 0x4c8   : > { %v1189_v24 = vpop.xlane.xlu1 %1188 }
 0x4c9   : > { %v1195_v28 = vadd.f32 %v1189_v24, %v1179_v27 }
 0x4ce   : > { %v1192_v20 = vpop.xlane.xlu2 %1191 }
 0x4cf   : > { %v1196_v23 = vadd.f32 %v1192_v20, %v1180_v21 }
 0x4d0   : > { %v1186_v29 = vpop.xlane.xlu0 %1185 }
 0x4d1   : > { %2073 = vrcp.f32 %v1196_v23  ;;  %v1194_v31 = vadd.f32 %v1186_v29, %v1178_v30  ;;  %v1853_v29 = vld [vmem:[%s3076_s18 + $0x10] sm:$0xff] }
 0x4d2   : > { %2075 = vrcp.f32 %v1195_v28 }
 0x4d3   : > { %2077 = vrcp.f32 %v1194_v31 }
 0x4d4   : > { %2079 = vpow2.f32 %v1157_v52 }
 0x4d7   : > { %v2074_v34 = vpop.eup %2073 }
 0x4d8   : > { %v2076_v38 = vpop.eup %2075 }
 0x4d9   : > { %v2078_v43 = vpop.eup %2077 }
 0x4da   : > { %v2080_v53 = vpop.eup %2079 }
 0x4db   : > { %v1177_v55 = vmul.f32 0.0, %v2080_v53 }
 0x4e0   : > { %v1274_v32 = vpop.f32.mrf.mxu2 }
 0x4e1   : > { %v1281_v33 = vadd.f32 %v1274_v32, %v1180_v21 }
 0x4e3   : > { %v1289_v35 = vmul.f32 %v2074_v34, %v1281_v33  ;;  %v1851_v34 = vld [vmem:[%s3076_s18] sm:$0xff] }
 0x4e4   : > { %v1255_v36 = vpop.f32.mrf.mxu1 }
 0x4e5   : > { %v1280_v37 = vadd.f32 %v1255_v36, %v1179_v27  ;;  %1299 = vrot.lane.b32.xlu1 %v1289_v35, %s2628_s27 }
 0x4e7   : > { %v1288_v39 = vmul.f32 %v2076_v38, %v1280_v37  ;;  %v1236_v40 = vpop.f32.mrf.mxu0 }
 0x4e8   : > { %v1279_v41 = vadd.f32 %v1236_v40, %v1178_v30  ;;  %v1276_v42 = vpop.f32.mrf.mxu2  ;;  %v2052_v30 = vld [vmem:[#allocation20] ss:$0 sm:$0xff] }
 0x4e9   : > { %1295 = vrot.lane.b32.xlu0 %v1288_v39, %s2629_s24 }
 0x4ea   : > { %v1287_v44 = vmul.f32 %v2078_v43, %v1279_v41 }
 0x4ec   : > { %v1257_v45 = vpop.f32.mrf.mxu1  ;;  %1291 = vrot.lane.b32.xlu2 %v1287_v44, %s2630_s0 }
 0x4ef   : > { %v1238_v46 = vpop.f32.mrf.mxu0 }
 0x50f   : > { %v1183_v54 = vpop.xlane.xlu0 %1182 }
 0x510   : > { %v1193_v56 = vadd.f32 %v1183_v54, %v1177_v55 }
 0x512   : > { %2081 = vrcp.f32 %v1193_v56 }
 0x518   : > { %v2082_v58 = vpop.eup %2081 }
 0x520   : > { %v1217_v47 = vpop.f32.mrf.mxu3 }
 0x521   : > { %v1278_v57 = vadd.f32 %v1217_v47, %v1177_v55  ;;  %v2053_v47 = vld [vmem:[#allocation23] ss:$0 sm:$0xff]  ;;  %v2054_v55 = vld [vmem:[%s3077_s19] ss:$0 sm:$0xff] }
 0x523   : > { %v1286_v60 = vmul.f32 %v2082_v58, %v1278_v57 }
 0x528   : > { %v1219_v48 = vpop.f32.mrf.mxu3 }
 0x546   : > { %v1292_v59 = vpop.permute.xlu2 %1291 }
 0x547   : > { %v1302_v61 = vsel %vm1053_vm6, %v1286_v60, %v1292_v59 }
 0x557   : > { %v1300_v63 = vpop.permute.xlu1 %1299 }
 0x55b   : > { %v1296_v62 = vpop.permute.xlu0 %1295 }
 0x55c   : > { %v1304_v1 = vsel %vm1303_vm9, %v1302_v61, %v1296_v62 }
 0x55d   : > { %v1306_v2 = vsel %vm1305_vm10, %v1304_v1, %v1300_v63 }
 0x55e   : > { %v1307_v3 = vpack.c.bf16 %v1306_v2, %v1306_v2 }
 0x560   : > { %1798 = vmatmul.msk.bf16.vlgmr.msra.gmra.mxu3 %vm841_vm0, %v1307_v3 }
 0x5e3   : > { %v1340_v5 = vpop.f32.mrf.mxu3 }
 0x5e4   : > { %v1341_v6 = vadd.f32 %v2051_v4, %v1340_v5 }
 0x5e6   : > { %v2999_v7 = vadd.f32 %v1341_v6, %v2918_v0 }
 0x5e8   : > { %v1345_v8 = vmul.f32 %v2999_v7, %v2999_v7 }
 0x5ea   : > { %v1346_v9 = vsel %vm841_vm0, %v1345_v8, 0.0 }
 0x5eb   : > { %v1342_v10 = vpop.f32.mrf.mxu3  ;;  %1347 = vadd.xlane.f32.xlu0 %v1346_v9 }
 0x65e   : > { %v1348_v16 = vpop.xlane.xlu0 %1347 }
 0x65f   : > { %v1349_v17 = vmul.f32 %v1348_v16, %v2935_v15  ;;  %v1854_v15 = vld [vmem:[%s3076_s18 + $0x18] sm:$0xff] }
 0x660   : > { %1499 = vmatpush.bf16.msrb.mxu2 %v1854_v15 }
 0x661   : > { %v1350_v0 = vadd.f32 1e-08, %v1349_v17 }
 0x663   : > { %2083 = vrsqrt.f32 %v1350_v0  ;;  %vm1357_vm12 = vweird.f32 %v1350_v0 }
 0x664   : > { %1500 = vmatpush.bf16.msrb.mxu2 %v1853_v29 }
 0x669   : > { %v2084_v18 = vpop.eup %2083 }
 0x66a   : > { %v1352_v19 = vmul.f32 %v2084_v18, %v1350_v0  ;;  %vm1358_vm11 = vweird.f32 %v2084_v18 }
 0x66b   : > { %vm1359_vm13 = vmor %vm1357_vm12, %vm1358_vm11 }
 0x66c   : > { %v1353_v20 = vmul.f32 %v2084_v18, %v1352_v19 }
 0x66e   : > { %v1354_v21 = vmul.f32 0.5, %v1353_v20 }
 0x670   : > { %v1355_v22 = vsub.f32 1.5, %v1354_v21 }
 0x672   : > { %v1356_v23 = vmul.f32 %v2084_v18, %v1355_v22 }
 0x674   : > { %v1360_v24 = vsel %vm1359_vm13, %v2084_v18, %v1356_v23 }
 0x675   : > { %v1361_v26 = vmul.f32 %v1360_v24, %v2999_v7 }
 0x677   : > { %v1362_v27 = vmul.f32 %v2938_v25, %v1361_v26  ;;  %v1852_v25 = vld [vmem:[%s3076_s18 + $0x8] sm:$0xff] }
 0x678   : > { %1501 = vmatpush.bf16.msrb.mxu2 %v1852_v25 }
 0x679   : > { %v1363_v28 = vpack.c.bf16 %v1362_v27, %v1362_v27 }
 0x67b   : > { %1807 = vmatmul.msk.bf16.vlgmr.msrb.gmra.mxu0 %vm841_vm0, %v1363_v28  ;;  %1816 = vmatmul.msk.bf16.vlgmr.msrb.gmra.mxu1 %vm841_vm0, %v1363_v28 }
 0x67c   : > { %1502 = vmatpush.bf16.msrb.mxu2 %v1851_v34 }
 0x6f8   : > { %v1396_v31 = vpop.f32.mrf.mxu0  ;;  %v1429_v32 = vpop.f32.mrf.mxu1 }
 0x6f9   : > { %v1397_v33 = vadd.f32 %v2052_v30, %v1396_v31  ;;  %v1430_v52 = vadd.f32 %v2053_v47, %v1429_v32 }
 0x6fb   : > { %v1817_v35 = vmul.f32 -1.442695, %v1397_v33 }
 0x6fd   : > { %2085 = vpow2.f32 %v1817_v35 }
 0x700   : > { %v1398_v36 = vpop.f32.mrf.mxu0  ;;  %v1431_v37 = vpop.f32.mrf.mxu1 }
 0x703   : > { %v2086_v38 = vpop.eup %2085 }
 0x704   : > { %v1436_v39 = vadd.f32 1.0, %v2086_v38 }
 0x706   : > { %2087 = vrcp.f32 %v1436_v39  ;;  %v1448_v43 = vand.u32 2147483648, %v1436_v39  ;;  %v1446_v45 = vand.u32 2147483647, %v1436_v39  ;;  %vm1442_vm15 = vweird.f32 %v1436_v39 }
 0x708   : > { %v1449_v48 = vor.u32 1.1754944e-38, %v1448_v43  ;;  %vm1447_vm2 = vcmp.eq.f32.partialorder %v1446_v45, 8.507059e+37 }
 0x70c   : > { %v2088_v40 = vpop.eup %2087 }
 0x70d   : > { %v1438_v41 = vmul.f32 %v2088_v40, %v1436_v39  ;;  %vm1443_vm14 = vweird.f32 %v2088_v40 }
 0x70e   : > { %vm1444_vm1 = vmor %vm1442_vm15, %vm1443_vm14 }
 0x70f   : > { %v1439_v42 = vsub.f32 1.0, %v1438_v41 }
 0x711   : > { %v1440_v44 = vmul.f32 %v2088_v40, %v1439_v42 }
 0x713   : > { %v1441_v46 = vadd.f32 %v2088_v40, %v1440_v44 }
 0x715   : > { %v1445_v49 = vsel %vm1444_vm1, %v2088_v40, %v1441_v46 }
 0x716   : > { %v1450_v50 = vsel %vm1447_vm2, %v1449_v48, %v1445_v49 }
 0x717   : > { %v1452_v51 = vmul.f32 %v1450_v50, %v1397_v33 }
 0x719   : > { %v1453_v53 = vmul.f32 %v1452_v51, %v1430_v52 }
 0x71b   : > { %v1454_v54 = vpack.c.bf16 %v1453_v53, %v1453_v53 }
 0x71d   : > { %1834 = vmatmul.msk.bf16.vlgmr.msrb.gmra.mxu2 %vm1491_vm3, %v1454_v54 }
 0x7a0   : > { %v1504_v56 = vpop.f32.mrf.mxu2 }
 0x7a1   : > { %v1505_v57 = vadd.f32 %v2054_v55, %v1504_v56 }
 0x7a3   : > { %v1508_v58 = vadd.f32 %v1505_v57, %v2999_v7 }
 0x7a5   : > { %1509 = vst.msk [vmem:[%s832_s1] sm:$0xff] %vm841_vm0, %v1508_v58 }
 0x7a6   : > { %2536 = shalt.err (!%p2533_p8)
}
 0x7a7   : > { %1911 = dma.vmem_to_hbm [thread:$0]  (%p2774_p5), %s1524_s29, 128, %s1526_s30, %s1511_s2  }
 0x7a8   : > { %v1506_v59 = vpop.f32.mrf.mxu2 }
 0x7a9 PF: > { %s3120_s28 = sld [smem:[#allocation37_spill]] }
 0x7aa   : > { %s3121_s24 = sld [smem:[#allocation35_spill]] }
 0x7af   : > { %p1988_p9 = scmp.ge.s32.totalorder %s3120_s28, 2 }
 0x7b0   : > { %s1537_s26 = sand.u32 1, %s3121_s24  }
 0x7b1   : > { %p1957_p10 = pnand %p1988_p9, %p2778_p6  ;;  %s1538_s1 = scalar_lea.sflag [#allocation4], %s1537_s26 }
 0x7b3   : > { %p1958_p11 = pneg %p1957_p10 }
 0x7b5   : > { %2586 = dma.done.wait (%p1958_p11), %s1538_s1, 128  }
 0x7b6   : > { %2588 = vsyncadd (%p1958_p11), %s1538_s1, 4294967168  ;;  %s3123_s24 = sld [smem:[#allocation38_spill]]  ;;  %s3126_s1 = smov %s2595_s22 }
 0x7b7   : > { %s3124_s5 = sld [smem:[#allocation36_spill]] }
 0x7b8   : > { %s3125_s23 = sld [smem:[#allocation39_spill]] }
 0x7bc   : > { %p38_p12 = scmp.ge.s32.totalorder %s3123_s24, 4  }
 0x7bd   : > { %s3127_s22 = smov %s3124_s5 }
 0x7be   :  { %40 = sbr.rel (!%p38_p12) target bundleno = 21 (0x15), region = 192 }
 0x7c3   :  { %1544 = vsyncpa [#allocation3], 1 }
 0x7c4   :  { %1546 = vsyncpa [#allocation3 + $0x1], 1 }
 0x7c5   :  { %1547 = vsyncpa [#allocation6], 1 }
 0x7c6   :  { %1548 = vsyncpa [#allocation9], 1 }
 0x7c7   :  { %1549 = vsyncpa [#allocation12], 1 }
 0x7c8   :  { %1550 = vsyncpa [#allocation15], 1 }
 0x7c9   :  { %1551 = vsyncpa [#allocation18], 1 }
 0x7ca   :  { %1552 = vsyncpa [#allocation21], 1 }
 0x7cb   :  { %1553 = vsyncpa [#allocation24], 1 }
 0x7cc   :  { %1554 = vsyncpa [#allocation4], 1 }
 0x7cd   :  { %1556 = vsyncpa [#allocation4 + $0x1], 1 }

// kernel: tpu_custom_call.1
= control target key start
LH: loop header
LB: loop body
LE: loop exit
PB: predicated region body
PF: predicated region fallthrough
CT: control target
= control target key end

     0   :  { %s3058_s0 = inlined_call_operand.vmem [shape: f32[2,8,32], index: 0, kind: input, shape index: {}]   ;;  %s3059_s1 = inlined_call_operand.hbm [shape: f32[1,32], index: 1, kind: input, shape index: {}]   ;;  %s3060_s2 = inlined_call_operand.vmem [shape: bf16[32,32], index: 2, kind: input, shape index: {}]   ;;  %s3061_s3 = inlined_call_operand.vmem [shape: f32[1,32], index: 3, kind: input, shape index: {}]   ;;  %s3062_s4 = inlined_call_operand.vmem [shape: bf16[32,32], index: 4, kind: input, shape index: {}]   ;;  %s3063_s5 = inlined_call_operand.hbm [shape: f32[1,32], index: 5, kind: input, shape index: {}]   ;;  %s3064_s6 = inlined_call_operand.hbm [shape: bf16[32,32], index: 6, kind: input, shape index: {}]   ;;  %s3065_s7 = inlined_call_operand.hbm [shape: f32[1,32], index: 7, kind: input, shape index: {}]   ;;  %s3066_s8 = inlined_call_operand.hbm [shape: bf16[32,32], index: 8, kind: input, shape index: {}]   ;;  %s3067_s9 = inlined_call_operand.hbm [shape: f32[1,32], index: 9, kind: input, shape index: {}]   ;;  %s3068_s10 = inlined_call_operand.hbm [shape: f32[8,32], index: 10, kind: input, shape index: {}]   ;;  %s3069_s11 = inlined_call_operand.hbm [shape: f32[8,32], index: 11, kind: input, shape index: {}]   ;;  %s3070_s12 = inlined_call_operand.hbm [shape: f32[8,32], index: 12, kind: input, shape index: {}]   ;;  %s3071_s13 = inlined_call_operand.hbm [shape: f32[8,32], index: 13, kind: input, shape index: {}]   ;;  %s3072_s14 = inlined_call_operand.hbm [shape: bf16[32,64], index: 14, kind: input, shape index: {}]   ;;  %s3073_s15 = inlined_call_operand.hbm [shape: f32[1,64], index: 15, kind: input, shape index: {}]   ;;  %s3074_s16 = inlined_call_operand.hbm [shape: bf16[32,64], index: 16, kind: input, shape index: {}]   ;;  %s3075_s17 = inlined_call_operand.hbm [shape: f32[1,64], index: 17, kind: input, shape index: {}]   ;;  %s3076_s18 = inlined_call_operand.vmem [shape: bf16[64,32], index: 18, kind: input, shape index: {}]   ;;  %s3077_s19 = inlined_call_operand.vmem [shape: f32[1,32], index: 19, kind: input, shape index: {}]   ;;  %s3078_s20 = inlined_call_operand.hbm [shape: f32[2,8,32], index: 20, kind: output, shape index: {}]  }
   0x1   :  { %3089 = sst [smem:[#allocation42_spill]] %s3058_s0 }
   0x2   :  { %3090 = sst [smem:[#allocation43_spill]] %s3059_s1 }
   0x3   :  { %3091 = sst [smem:[#allocation44_spill]] %s3060_s2 }
   0x4   :  { %3092 = sst [smem:[#allocation45_spill]] %s3061_s3 }
   0x5   :  { %3093 = sst [smem:[#allocation46_spill]] %s3062_s4 }
   0x6   :  { %3094 = sst [smem:[#allocation47_spill]] %s3063_s5 }
   0x7   :  { %3095 = sst [smem:[#allocation48_spill]] %s3064_s6 }
   0x8   :  { %3096 = sst [smem:[#allocation49_spill]] %s3065_s7 }
   0x9   :  { %3097 = sst [smem:[#allocation50_spill]] %s3067_s9 }
   0xa   :  { %25 = vsyncpa [#allocation3], 0 }
   0xb   :  { %26 = vsyncpa [#allocation6], 0 }
   0xc   :  { %27 = vsyncpa [#allocation9], 0 }
   0xd   :  { %28 = vsyncpa [#allocation12], 0 }
   0xe   :  { %29 = vsyncpa [#allocation15], 0 }
   0xf   :  { %30 = vsyncpa [#allocation18], 0 }
  0x10   :  { %31 = vsyncpa [#allocation21], 0 }
  0x11   :  { %32 = vsyncpa [#allocation24], 0 }
  0x12   :  { %33 = vsyncpa [#allocation4], 0 }
  0x13   :  { %35 = vsyncpa [#allocation4 + $0x1], 0  ;;  %s2736_s1 = smov 0   ;;  %s2738_s22 = smov 0  }
  0x14   :  { %s2740_s23 = smov 0   ;;  %s2742_s24 = smov 0  }
  0x15 LB: > { %3098 = sst [smem:[#allocation35_spill]] %s2591_s1  ;;  %s2757_s2 = sadd.s32 4294967295, %s2603_s24   ;;  %s2603_s24 = sphi %s2742_s24, %s3123_s24   ;;  %s2599_s23 = sphi %s2740_s23, %s3125_s23   ;;  %s2595_s22 = sphi %s2738_s22, %s3127_s22   ;;  %s2591_s1 = sphi %s2736_s1, %s3126_s1  }
  0x16   : > { %3099 = sst [smem:[#allocation36_spill]] %s2599_s23  ;;  %s1721_s25 = sadd.s32 4294967294, %s2603_s24  }
  0x17   : > { %3100 = sst [smem:[#allocation37_spill]] %s2603_s24  ;;  %s2761_s3 = sadd.s32 1, %s2603_s24  }
  0x18   : > { %3101 = sst [smem:[#allocation38_spill]] %s2761_s3  ;;  %s473_s26 = sadd.s32 1, %s2599_s23 }
  0x19   : > { %s470_s27 = ssub.s32 %s2603_s24, %s2761_s3  ;;  %p483_p0 = scmp.ne.s32.totalorder %s2599_s23, %s2595_s22 }
  0x1a   : > { %p471_p1 = scmp.eq.s32.totalorder %s470_s27, 0  ;;  %p484_p2 = scmp.eq.s32.totalorder %s2757_s2, 1 }
  0x1b   : > { %p489_p3 = scmp.ne.s32.totalorder %s2595_s22, %s2591_s1  ;;  %p490_p4 = scmp.eq.s32.totalorder %s1721_s25, 1 }
  0x1c   : > { %s2772_s28 = scalar_select %p471_p1, %s2599_s23, %s473_s26  }
  0x1d   : > { %p2774_p5 = por %p484_p2, %p483_p0  ;;  %p2778_p6 = por %p490_p4, %p489_p3 }
  0x1e   : > { %3102 = sst [smem:[#allocation39_spill]] %s2772_s28  ;;  %p1722_p7 = scmp.ge.s32.totalorder %s2603_s24, 1 }
  0x1f   : > { %s3103_s4 = scalar_select %p2774_p5, 1, 0 }
  0x20   : > { %s3105_s29 = scalar_select %p2778_p6, 1, 0 }
  0x21   : > { %3104 = sst [smem:[#allocation40_spill]] %s3103_s4  ;;  %p497_p8 = scmp.lt.s32.totalorder %s2603_s24, 3 }
  0x22   : > { %3106 = sst [smem:[#allocation41_spill]] %s3105_s29  ;;  %p1960_p9 = scmp.eq.s32.totalorder %s2757_s2, 0 }
  0x23   : > { %p2785_p10 = pnand %p1722_p7, %p497_p8  ;;  %s3108_s5 = sld [smem:[#allocation47_spill]] }
  0x24   : > { %s2605_s26 = smov [#allocation5]   ;;  %s3109_s7 = sld [smem:[#allocation49_spill]] }
  0x25   : > { %p1913_p11 = pneg %p2785_p10  ;;  %s532_s27 = sshll.u32 %s2605_s26, 4  ;;  %s533_s27 = int_to_ptr.vmem [resolvable:$true] %s532_s27 }
  0x26   : > { %s3111_s9 = sld [smem:[#allocation50_spill]]  ;;  %s2606_s1 = smov [#allocation8]  }
  0x27   : > { %p2799_p12 = pnand %p1960_p9, %p1913_p11  ;;  %s558_s26 = sshll.u32 %s2606_s1, 4  ;;  %s559_s26 = int_to_ptr.vmem [resolvable:$true] %s558_s26 }
  0x28   : > { %s2607_s24 = smov [#allocation11]   ;;  %s2608_s0 = smov [#allocation14]  }
  0x29   : > { %s530_s25 = sshll.u32 %s3108_s5, 4  ;;  %s584_s4 = sshll.u32 %s2607_s24, 4  ;;  %s531_s25 = int_to_ptr.hbm [resolvable:$true] %s530_s25  ;;  %s585_s4 = int_to_ptr.vmem [resolvable:$true] %s584_s4 }
  0x2a   : > { %s556_s3 = sshll.u32 %s3109_s7, 4  ;;  %s606_s7 = sshll.u32 %s3069_s11, 4  ;;  %s557_s3 = int_to_ptr.hbm [resolvable:$true] %s556_s3  ;;  %s607_s7 = int_to_ptr.hbm [resolvable:$true] %s606_s7 }
  0x2b   : > { %1919 = dma.hbm_to_vmem [thread:$0]  (!%p2799_p12), %s531_s25, 16, %s533_s27, [#allocation6]  }
  0x2c   : > { %s582_s5 = sshll.u32 %s3111_s9, 4  ;;  %s608_s1 = sshll.u32 %s2608_s0, 4  ;;  %s583_s5 = int_to_ptr.hbm [resolvable:$true] %s582_s5  ;;  %s609_s1 = int_to_ptr.vmem [resolvable:$true] %s608_s1 }
  0x2d   : > { %1925 = dma.hbm_to_vmem [thread:$0]  (!%p2799_p12), %s557_s3, 16, %s559_s26, [#allocation9]  }
  0x2e   : > { %1931 = dma.hbm_to_vmem [thread:$0]  (!%p2799_p12), %s583_s5, 16, %s585_s4, [#allocation12]  }
  0x2f   : > { %s630_s25 = sshll.u32 %s3071_s13, 4  ;;  %s656_s26 = sshll.u32 %s3073_s15, 4  ;;  %s631_s25 = int_to_ptr.hbm [resolvable:$true] %s630_s25  ;;  %s657_s26 = int_to_ptr.hbm [resolvable:$true] %s656_s26 }
  0x30   : > { %1937 = dma.hbm_to_vmem [thread:$0]  (!%p2799_p12), %s607_s7, 128, %s609_s1, [#allocation15]  }
  0x31   : > { %s2609_s24 = smov [#allocation17]   ;;  %s2610_s5 = smov [#allocation20]  }
  0x32   : > { %s632_s23 = sshll.u32 %s2609_s24, 4  ;;  %s658_s4 = sshll.u32 %s2610_s5, 4  ;;  %s633_s23 = int_to_ptr.vmem [resolvable:$true] %s632_s23  ;;  %s659_s4 = int_to_ptr.vmem [resolvable:$true] %s658_s4 }
  0x33   : > { %1943 = dma.hbm_to_vmem [thread:$0]  (!%p2799_p12), %s631_s25, 128, %s633_s23, [#allocation18]  }
  0x34   : > { %s3112_s0 = sld [smem:[#allocation43_spill]]  ;;  %s2611_s27 = smov [#allocation2]  }
  0x35   : > { %1949 = dma.hbm_to_vmem [thread:$0]  (!%p2799_p12), %s657_s26, 16, %s659_s4, [#allocation21]  }
  0x36   : > { %s3113_s6 = sld [smem:[#allocation48_spill]]  ;;  %s511_s24 = sshll.u32 %s2611_s27, 4  ;;  %s512_s24 = int_to_ptr.vmem [resolvable:$true] %s511_s24 }
  0x37   : > { %s2612_s25 = smov [#allocation7]   ;;  %s2613_s5 = smov 64  }
  0x38   : > { %s543_s23 = sshll.u32 %s2612_s25, 4  ;;  %s2614_s9 = smov 4   ;;  %s544_s23 = int_to_ptr.vmem [resolvable:$true] %s543_s23 }
  0x39   : > { %s567_s28 = sshll.u32 %s3066_s8, 4  ;;  %s594_s27 = sshll.u32 %s3068_s10, 4  ;;  %s568_s28 = int_to_ptr.hbm [resolvable:$true] %s567_s28  ;;  %s595_s27 = int_to_ptr.hbm [resolvable:$true] %s594_s27 }
  0x3a   : > { %s509_s21 = sshll.u32 %s3112_s0, 4  ;;  %s2615_s0 = smov [#allocation10]   ;;  %s510_s21 = int_to_ptr.hbm [resolvable:$true] %s509_s21 }
  0x3b   : > { %1916 = dma.hbm_to_vmem [thread:$0]  (!%p2799_p12), %s510_s21, 16, %s512_s24, [#allocation3]  }
  0x3c   : > { %s541_s3 = sshll.u32 %s3113_s6, 4  ;;  %s569_s7 = sshll.u32 %s2615_s0, 4  ;;  %s542_s3 = int_to_ptr.hbm [resolvable:$true] %s541_s3  ;;  %s570_s7 = int_to_ptr.vmem [resolvable:$true] %s569_s7 }
  0x3d   : > { %1922 = dma.hbm_to_vmem [thread:$0]  (!%p2799_p12), %s542_s3, 256, %s544_s23, [#allocation6], %s2613_s5, %s2613_s5, %s2614_s9  }
  0x3e   : > { %1928 = dma.hbm_to_vmem [thread:$0]  (!%p2799_p12), %s568_s28, 256, %s570_s7, [#allocation9], %s2613_s5, %s2613_s5, %s2614_s9  }
  0x3f   : > { %s2616_s3 = smov [#allocation13]   ;;  %s618_s26 = sshll.u32 %s3070_s12, 4  ;;  %s619_s26 = int_to_ptr.hbm [resolvable:$true] %s618_s26 }
  0x40   : > { %s596_s24 = sshll.u32 %s2616_s3, 4  ;;  %s641_s21 = sshll.u32 %s3072_s14, 4  ;;  %s597_s24 = int_to_ptr.vmem [resolvable:$true] %s596_s24  ;;  %s642_s21 = int_to_ptr.hbm [resolvable:$true] %s641_s21 }
  0x41   : > { %1934 = dma.hbm_to_vmem [thread:$0]  (!%p2799_p12), %s595_s27, 128, %s597_s24, [#allocation12]  }
  0x42   : > { %s2617_s1 = smov [#allocation16]   ;;  %s2618_s28 = smov [#allocation19]  }
  0x43   : > { %s620_s6 = sshll.u32 %s2617_s1, 4  ;;  %s643_s7 = sshll.u32 %s2618_s28, 4  ;;  %s621_s6 = int_to_ptr.vmem [resolvable:$true] %s620_s6  ;;  %s644_s7 = int_to_ptr.vmem [resolvable:$true] %s643_s7 }
  0x44   : > { %1940 = dma.hbm_to_vmem [thread:$0]  (!%p2799_p12), %s619_s26, 128, %s621_s6, [#allocation15]  }
  0x45   : > { %s667_s23 = sshll.u32 %s3074_s16, 4  ;;  %s682_s4 = sshll.u32 %s3075_s17, 4  ;;  %s668_s23 = int_to_ptr.hbm [resolvable:$true] %s667_s23  ;;  %s683_s4 = int_to_ptr.hbm [resolvable:$true] %s682_s4 }
  0x46   : > { %1946 = dma.hbm_to_vmem [thread:$0]  (!%p2799_p12), %s642_s21, 256, %s644_s7, [#allocation18], %s2613_s5, %s2613_s5, %s2614_s9  }
  0x47   : > { %s2619_s0 = smov [#allocation22]   ;;  %s2620_s26 = smov [#allocation23]  }
  0x48   : > { %s669_s6 = sshll.u32 %s2619_s0, 4  ;;  %s684_s1 = sshll.u32 %s2620_s26, 4  ;;  %s670_s6 = int_to_ptr.vmem [resolvable:$true] %s669_s6  ;;  %s685_s1 = int_to_ptr.vmem [resolvable:$true] %s684_s1 }
  0x49   : > { %1952 = dma.hbm_to_vmem [thread:$0]  (!%p2799_p12), %s668_s23, 256, %s670_s6, [#allocation21], %s2613_s5, %s2613_s5, %s2614_s9  }
  0x4a   : > { %1955 = dma.hbm_to_vmem [thread:$0]  (!%p2799_p12), %s683_s4, 16, %s685_s1, [#allocation24]  }
  0x4b   : > { %710 = sbr.rel (%p2785_p10) target bundleno = 1961 (0x7a9), region = 100 }
  0x50   : > { %2554 = dma.done.wait (%p1960_p9), [#allocation3], 16  }
  0x51   : > { %2556 = vsyncadd (%p1960_p9), [#allocation3], 4294967280 }
  0x52   : > { %2558 = dma.done.wait (%p1960_p9), [#allocation6], 272  }
  0x53   : > { %2560 = vsyncadd (%p1960_p9), [#allocation6], 4294967024 }
  0x54   : > { %2562 = dma.done.wait (%p1960_p9), [#allocation9], 272  }
  0x55   : > { %2564 = vsyncadd (%p1960_p9), [#allocation9], 4294967024 }
  0x56   : > { %2566 = dma.done.wait (%p1960_p9), [#allocation12], 144  }
  0x57   : > { %2568 = vsyncadd (%p1960_p9), [#allocation12], 4294967152 }
  0x58   : > { %2570 = dma.done.wait (%p1960_p9), [#allocation15], 256  }
  0x59   : > { %2572 = vsyncadd (%p1960_p9), [#allocation15], 4294967040 }
  0x5a   : > { %2574 = dma.done.wait (%p1960_p9), [#allocation18], 384  }
  0x5b   : > { %2576 = vsyncadd (%p1960_p9), [#allocation18], 4294966912 }
  0x5c   : > { %2578 = dma.done.wait (%p1960_p9), [#allocation21], 272  }
  0x5d   : > { %2580 = vsyncadd (%p1960_p9), [#allocation21], 4294967024 }
  0x5e   : > { %2582 = dma.done.wait (%p1960_p9), [#allocation24], 16  }
  0x5f   : > { %2584 = vsyncadd (%p1960_p9), [#allocation24], 4294967280  ;;  %p833_p13 = scmp.lt.s32.totalorder %s2757_s2, 1  ;;  %s3114_s21 = sld [smem:[#allocation42_spill]]  ;;  %vm841_vm0 = vcmask 261120   ;;  %v2621_v3 = vmov 32.0  }
  0x60   : > { %2055 = vrcp.f32 %v2621_v3  ;;  %s3115_s25 = sld [smem:[#allocation44_spill]]  ;;  %v1844_v9 = vld [vmem:[#allocation7 + $0x8] sm:$0xff]  ;;  %v1843_v13 = vld [vmem:[#allocation7] sm:$0xff]  ;;  %v2938_v25 = vld [vmem:[#allocation2] ss:$0 sm:$0xff]  ;;  %vm974_vm5 = vcmask 1047808  }
  0x61   : > { %s834_s29 = scalar_select %p833_p13, %s2757_s2, 1  ;;  %965 = vmatpush.bf16.msra.mxu2 %v1844_v9  ;;  %v993_v30 = vld [vmem:[#allocation17] sm:$0xff]  ;;  %v973_v45 = vld [vmem:[#allocation14] sm:$0xff]  ;;  %v992_v55 = vld [vmem:[#allocation16] sm:$0xff]  ;;  %vm1053_vm6 = vcmask 64512   ;;  %vm1204_vm7 = vcmask 1043456  }
  0x62   : > { %s3116_s24 = sld [smem:[#allocation46_spill]]  ;;  %v2049_v32 = vld [vmem:[#allocation5] ss:$0 sm:$0xff]  ;;  %v2050_v54 = vld [vmem:[#allocation8] ss:$0 sm:$0xff]  ;;  %s2625_s7 = smov 104  }
  0x63   : > { %s1754_s30 = sshll.u32 %s834_s29, 3  ;;  %s2622_s29 = smov 1   ;;  %vm1303_vm9 = vcmask 130048   ;;  %vm1305_vm10 = vcmask 195584  }
  0x64   : > { %1002 = vrot.lane.b32.xlu2 %v993_v30, %s2622_s29  ;;  %s3118_s9 = sld [smem:[#allocation45_spill]]  ;;  %s2626_s3 = smov 120  }
  0x65   : > { %s836_s28 = scalar_lea.vmem %s3114_s21, %s1754_s30  ;;  %966 = vmatpush.bf16.msra.mxu2 %v1843_v13  ;;  %s2623_s21 = smov 32  }
  0x66   : > { %v2918_v0 = vld [vmem:[%s836_s28] sm:$0xff]  ;;  %v2056_v4 = vpop.eup %2055  ;;  %v1840_v7 = vld [vmem:[%s3115_s25 + $0x8] sm:$0xff]  ;;  %s2624_s28 = smov 127   ;;  %s2627_s23 = smov 112  }
  0x67   : > { %v840_v1 = vmul.f32 %v2918_v0, %v2918_v0  ;;  %v846_v5 = vmul.f32 32.0, %v2056_v4  ;;  %899 = vmatpush.bf16.msra.mxu0 %v1840_v7  ;;  %v1839_v11 = vld [vmem:[%s3115_s25] sm:$0xff]  ;;  %vm850_vm1 = vweird.f32 %v2056_v4  ;;  %s2628_s27 = smov 24   ;;  %s2630_s0 = smov 8  }
  0x68   : > { %s3117_s4 = smov %s3116_s24  ;;  %v1842_v8 = vld [vmem:[%s3116_s24 + $0x8] sm:$0xff]  ;;  %s2629_s24 = smov 16  }
  0x69   : > { %v842_v2 = vsel %vm841_vm0, %v840_v1, 0.0  ;;  %v847_v6 = vsub.f32 1.0, %v846_v5  ;;  %932 = vmatpush.bf16.msra.mxu1 %v1842_v8  ;;  %v1841_v12 = vld [vmem:[%s3117_s4] sm:$0xff]  ;;  %v972_v1 = vld [vmem:[#allocation13] sm:$0xff] }
  0x6a   : > { %843 = vadd.xlane.f32.xlu0 %v842_v2  ;;  %v2048_v31 = vld [vmem:[%s3118_s9] ss:$0 sm:$0xff] }
  0x6b   : > { %v848_v10 = vmul.f32 %v2056_v4, %v847_v6  ;;  %900 = vmatpush.bf16.msra.mxu0 %v1839_v11 }
  0x6d   : > { %v849_v14 = vadd.f32 %v2056_v4, %v848_v10  ;;  %933 = vmatpush.bf16.msra.mxu1 %v1841_v12 }
  0x6f   : > { %v2935_v15 = vsel %vm850_vm1, %v2056_v4, %v849_v14 }
  0xbe   : > { %v1003_v46 = vpop.permute.xlu2 %1002 }
  0xdd   : > { %v844_v16 = vpop.xlane.xlu0 %843 }
  0xde   : > { %v852_v17 = vmul.f32 %v2935_v15, %v844_v16 }
  0xe0   : > { %v853_v18 = vadd.f32 1e-08, %v852_v17 }
  0xe2   : > { %2057 = vrsqrt.f32 %v853_v18  ;;  %vm860_vm3 = vweird.f32 %v853_v18 }
  0xe8   : > { %v2058_v19 = vpop.eup %2057 }
  0xe9   : > { %v855_v20 = vmul.f32 %v2058_v19, %v853_v18  ;;  %vm861_vm2 = vweird.f32 %v2058_v19 }
  0xea   : > { %vm862_vm4 = vmor %vm860_vm3, %vm861_vm2  ;;  %vm1491_vm3 = vcmask 523264  }
  0xeb   : > { %v856_v21 = vmul.f32 %v2058_v19, %v855_v20 }
  0xed   : > { %v857_v22 = vmul.f32 0.5, %v856_v21 }
  0xef   : > { %v858_v23 = vsub.f32 1.5, %v857_v22 }
  0xf1   : > { %v859_v24 = vmul.f32 %v2058_v19, %v858_v23 }
  0xf3   : > { %v863_v26 = vsel %vm862_vm4, %v2058_v19, %v859_v24  ;;  %v1130_v24 = vlaneseq }
  0xf4   : > { %v864_v27 = vmul.f32 %v863_v26, %v2918_v0 }
  0xf5   : > { %v1131_v26 = vshrl.u32 %v1130_v24, 7 }
  0xf6   : > { %v868_v28 = vmul.f32 %v2938_v25, %v864_v27  ;;  %v1133_v27 = vand.u32 127, %v1130_v24 }
  0xf8   : > { %v869_v29 = vpack.c.bf16 %v868_v28, %v868_v28  ;;  %vm1134_vm8 = vcmp.ge.s32.totalorder %v1131_v26, %v1133_v27 }
  0xfa   : > { %1763 = vmatmul.msk.bf16.vlgmr.msra.gmra.mxu0 %vm841_vm0, %v869_v29  ;;  %1772 = vmatmul.msk.bf16.vlgmr.msra.gmra.mxu1 %vm841_vm0, %v869_v29 }
  0xfb   : > { %1781 = vmatmul.msk.bf16.vlgmr.msra.gmra.mxu2 %vm841_vm0, %v869_v29 }
 0x177   : > { %v902_v33 = vpop.f32.mrf.mxu0  ;;  %v935_v34 = vpop.f32.mrf.mxu1 }
 0x178   : > { %v903_v35 = vadd.f32 %v2048_v31, %v902_v33  ;;  %v936_v36 = vadd.f32 %v2049_v32, %v935_v34 }
 0x17a   : > { %994 = vrot.lane.b32.xlu0 %v936_v36, %s2623_s21  ;;  %975 = vrot.lane.b32.xlu1 %v903_v35, %s2623_s21  ;;  %v1000_v57 = vmul.f32 %v992_v55, %v936_v36  ;;  %v981_v2 = vmul.f32 %v972_v1, %v903_v35 }
 0x17e   : > { %v968_v37 = vpop.f32.mrf.mxu2 }
 0x17f   : > { %v904_v38 = vpop.f32.mrf.mxu0  ;;  %v937_v39 = vpop.f32.mrf.mxu1  ;;  %v2952_v56 = vadd.f32 %v2050_v54, %v968_v37 }
 0x181   : > { %v1049_v60 = vpack.c.bf16 %v2952_v56, %v2952_v56 }
 0x183   : > { %v1206_v63 = vsel %vm1204_vm7, %v1049_v60, 0 }
 0x186   : > { %v970_v40 = vpop.f32.mrf.mxu2 }
 0x1ec   : > { %v995_v41 = vpop.permute.xlu0 %994  ;;  %v976_v42 = vpop.permute.xlu1 %975 }
 0x1ed   : > { %v996_v43 = vsel %vm974_vm5, %v995_v41, %v936_v36  ;;  %v977_v44 = vsel %vm974_vm5, %v976_v42, %v903_v35 }
 0x1ee   : > { %997 = vrot.lane.b32.xlu1 %v996_v43, %s2623_s21  ;;  %978 = vrot.lane.b32.xlu2 %v977_v44, %s2623_s21 }
 0x1f6   : > { %983 = vrot.lane.b32.xlu1 %v973_v45, %s2622_s29 }
 0x248   : > { %v979_v50 = vpop.permute.xlu2 %978 }
 0x249   : > { %v980_v51 = vsel %vm974_vm5, %v979_v50, %v903_v35 }
 0x260   : > { %v998_v47 = vpop.permute.xlu1 %997 }
 0x261   : > { %v999_v48 = vsel %vm974_vm5, %v998_v47, %v936_v36 }
 0x262   : > { %v1005_v49 = vmul.f32 %v1003_v46, %v999_v48 }
 0x264   : > { %1007 = vrot.lane.b32.xlu2 %v1005_v49, %s2624_s28 }
 0x268   : > { %v984_v52 = vpop.permute.xlu1 %983 }
 0x269   : > { %v986_v53 = vmul.f32 %v984_v52, %v980_v51 }
 0x26b   : > { %988 = vrot.lane.b32.xlu1 %v986_v53, %s2624_s28  ;;  %s830_s28 = sand.u32 1, %s2595_s22  }
 0x2be   : > { %v1008_v58 = vpop.permute.xlu2 %1007 }
 0x2bf   : > { %v1010_v59 = vadd.f32 %v1008_v58, %v1000_v57 }
 0x2c1   : > { %1032 = vrot.lane.b32.xlu2 %v1010_v59, %s2625_s7  ;;  %1026 = vrot.lane.b32.xlu1 %v1010_v59, %s2626_s3  ;;  %v1035_v61 = vpack.c.bf16 %v1010_v59, %v1010_v59 }
 0x2c3   : > { %v1058_v62 = vsel %vm1053_vm6, %v1035_v61, 0 }
 0x2c4   : > { %1067 = vmatpush.bf16.xpose.msra.mxu3 %v1058_v62 }
 0x2c9   : > { %1029 = vrot.lane.b32.xlu2 %v1010_v59, %s2627_s23 }
 0x2cc   : > { %1215 = vmatpush.bf16.msrb.mxu3 %v1206_v63 }
 0x2dd   : > { %v989_v3 = vpop.permute.xlu1 %988 }
 0x2de   : > { %v991_v4 = vadd.f32 %v989_v3, %v981_v2 }
 0x2e0   : > { %1015 = vrot.lane.b32.xlu1 %v991_v4, %s2627_s23  ;;  %1018 = vrot.lane.b32.xlu0 %v991_v4, %s2625_s7  ;;  %v1021_v5 = vpack.c.bf16 %v991_v4, %v991_v4 }
 0x2e2   : > { %1782 = vmatmul.msk.bf16.vlgmr.msra.gmra.mxu3 %vm1053_vm6, %v1021_v5 }
 0x2e8   : > { %1012 = vrot.lane.b32.xlu0 %v991_v4, %s2626_s3 }
 0x31b   : > { %v1033_v6 = vpop.permute.xlu2 %1032 }
 0x31c   : > { %v1038_v7 = vpack.c.bf16 %v1033_v6, %v1033_v6 }
 0x31e   : > { %v1115_v8 = vsel %vm1053_vm6, %v1038_v7, 0 }
 0x31f   : > { %1124 = vmatpush.bf16.xpose.msrb.mxu2 %v1115_v8 }
 0x323   : > { %v1030_v9 = vpop.permute.xlu2 %1029 }
 0x324   : > { %v1037_v10 = vpack.c.bf16 %v1030_v9, %v1030_v9 }
 0x326   : > { %v1096_v11 = vsel %vm1053_vm6, %v1037_v10, 0 }
 0x327   : > { %1105 = vmatpush.bf16.xpose.msrb.mxu1 %v1096_v11 }
 0x333   : > { %v1027_v12 = vpop.permute.xlu1 %1026 }
 0x334   : > { %v1036_v13 = vpack.c.bf16 %v1027_v12, %v1027_v12 }
 0x336   : > { %v1077_v14 = vsel %vm1053_vm6, %v1036_v13, 0 }
 0x337   : > { %1086 = vmatpush.bf16.xpose.msrb.mxu0 %v1077_v14 }
 0x352   : > { %v1016_v16 = vpop.permute.xlu1 %1015  ;;  %v1019_v17 = vpop.permute.xlu0 %1018 }
 0x353   : > { %v1023_v18 = vpack.c.bf16 %v1016_v16, %v1016_v16  ;;  %v1024_v19 = vpack.c.bf16 %v1019_v17, %v1019_v17 }
 0x355   : > { %1784 = vmatmul.msk.bf16.vlgmr.msrb.gmra.mxu1 %vm1053_vm6, %v1023_v18  ;;  %1785 = vmatmul.msk.bf16.vlgmr.msrb.gmra.mxu2 %vm1053_vm6, %v1024_v19 }
 0x35a   : > { %v1013_v20 = vpop.permute.xlu0 %1012 }
 0x35b   : > { %v1022_v21 = vpack.c.bf16 %v1013_v20, %v1013_v20 }
 0x35d   : > { %1783 = vmatmul.msk.bf16.vlgmr.msrb.gmra.mxu0 %vm1053_vm6, %v1022_v21 }
 0x365   : > { %v1069_v22 = vpop.f32.mrf.mxu3 }
 0x366   : > { %v1137_v40 = vsel %vm1134_vm8, %v1069_v22, -1e+30 }
 0x367   : > { %v1141_v41 = vsel %vm1053_vm6, %v1137_v40, -inf }
 0x36d   : > { %v1071_v23 = vpop.f32.mrf.mxu3 }
 0x3d2   : > { %v1107_v28 = vpop.f32.mrf.mxu1 }
 0x3d3   : > { %v1139_v29 = vsel %vm1134_vm8, %v1107_v28, -1e+30 }
 0x3d4   : > { %v1147_v30 = vsel %vm1053_vm6, %v1139_v29, -inf }
 0x3d5   : > { %1148 = vmax.xlane.f32.xlu1 %v1147_v30 }
 0x3d8   : > { %v1126_v31 = vpop.f32.mrf.mxu2 }
 0x3d9   : > { %v1140_v32 = vsel %vm1134_vm8, %v1126_v31, -1e+30 }
 0x3da   : > { %v1088_v33 = vpop.f32.mrf.mxu0  ;;  %v1109_v34 = vpop.f32.mrf.mxu1  ;;  %v1150_v35 = vsel %vm1053_vm6, %v1140_v32, -inf }
 0x3db   : > { %v1138_v36 = vsel %vm1134_vm8, %v1088_v33, -1e+30  ;;  %1151 = vmax.xlane.f32.xlu2 %v1150_v35 }
 0x3dc   : > { %v1144_v37 = vsel %vm1053_vm6, %v1138_v36, -inf }
 0x3dd   : > { %1145 = vmax.xlane.f32.xlu0 %v1144_v37 }
 0x3e0   : > { %v1128_v38 = vpop.f32.mrf.mxu2 }
 0x3e2   : > { %v1090_v39 = vpop.f32.mrf.mxu0 }
 0x3ee   : > { %1043 = vrot.lane.b32.xlu1 %v2952_v56, %s2627_s23 }
 0x3f1   : > { %1040 = vrot.lane.b32.xlu0 %v2952_v56, %s2626_s3  ;;  %s1836_s3 = sshll.u32 %s2757_s2, 3  ;;  %s1511_s2 = scalar_lea.sflag [#allocation4], %s830_s28 }
 0x3f2   : > { %s1521_s26 = scalar_lea.hbm %s3078_s20, %s1836_s3 }
 0x3f3   : > { %1046 = vrot.lane.b32.xlu2 %v2952_v56, %s2625_s7  ;;  %s1753_s7 = sshll.u32 %s830_s28, 3  ;;  %s1525_s30 = sshll.u32 %s1521_s26, 4  ;;  %s1526_s30 = int_to_ptr.hbm [resolvable:$true] %s1525_s30 }
 0x3f4   : > { %s832_s1 = scalar_lea.vmem [#allocation25], %s1753_s7  ;;  %s2523_s5 = sshra.s32 %s1526_s30, 4  ;;  %s2524_s5 = int_to_ptr.hbm [resolvable:$true] %s2523_s5 }
 0x3f5   : > { %s1523_s29 = sshll.u32 %s832_s1, 4  ;;  %s2525_s9 = scalar_lea.hbm %s2524_s5, 8  ;;  %s1524_s29 = int_to_ptr.vmem [resolvable:$true] %s1523_s29 }
 0x3f6   : > { %p2526_p0 = scmp.ne.s32.totalorder %s2524_s5, %s2525_s9  ;;  %s2529_s7 = scalar_lea.hbm %s3078_s20, 16 }
 0x3f7   : > { %p2530_p3 = scmp.lt.s32.totalorder %s2524_s5, %s3078_s20  ;;  %p2531_p4 = scmp.lt.s32.totalorder %s2529_s7, %s2525_s9 }
 0x3f8   : > { %p2527_p1 = pnand %p2526_p0, %p2774_p5 }
 0x3f9   : > { %p2532_p7 = por %p2531_p4, %p2530_p3 }
 0x3fa   : > { %p2528_p2 = pneg %p2527_p1 }
 0x3fc   : > { %p2533_p8 = pnand %p2532_p7, %p2528_p2 }
 0x41c   : > { %1142 = vmax.xlane.f32.xlu2 %v1141_v41 }
 0x448   : > { %v1149_v42 = vpop.xlane.xlu1 %1148 }
 0x449   : > { %v1167_v43 = vsub.f32 %v1139_v29, %v1149_v42  ;;  %v1155_v13 = vsub.f32 -inf, %v1149_v42 }
 0x44b   : > { %v1173_v44 = vmul.f32 1.442695, %v1167_v43  ;;  %v1161_v17 = vmul.f32 1.442695, %v1155_v13  ;;  %v1847_v13 = vld [vmem:[#allocation19] sm:$0xff] }
 0x44d   : > { %2059 = vpow2.f32 %v1173_v44 }
 0x44e   : > { %v1152_v45 = vpop.xlane.xlu2 %1151 }
 0x44f   : > { %v1168_v46 = vsub.f32 %v1140_v32, %v1152_v45  ;;  %v1156_v12 = vsub.f32 -inf, %v1152_v45 }
 0x450   : > { %v1146_v47 = vpop.xlane.xlu0 %1145 }
 0x451   : > { %v1175_v48 = vmul.f32 1.442695, %v1168_v46  ;;  %v1166_v49 = vsub.f32 %v1138_v36, %v1146_v47  ;;  %v1163_v14 = vmul.f32 1.442695, %v1156_v12  ;;  %v1154_v16 = vsub.f32 -inf, %v1146_v47  ;;  %v1850_v12 = vld [vmem:[#allocation22 + $0x8] sm:$0xff] }
 0x453   : > { %v1171_v50 = vmul.f32 1.442695, %v1166_v49  ;;  %v2060_v51 = vpop.eup %2059  ;;  %2061 = vpow2.f32 %v1175_v48  ;;  %v1159_v18 = vmul.f32 1.442695, %v1154_v16  ;;  %v1846_v49 = vld [vmem:[#allocation10 + $0x8] sm:$0xff] }
 0x454   : > { %v1187_v52 = vsel %vm1053_vm6, %v2060_v51, 0.0  ;;  %v1199_v3 = vpack.c.bf16 %v2060_v51, %v2060_v51  ;;  %1337 = vmatpush.bf16.msra.mxu3 %v1846_v49  ;;  %v1845_v51 = vld [vmem:[#allocation10] sm:$0xff] }
 0x455   : > { %2063 = vpow2.f32 %v1171_v50  ;;  %1188 = vadd.xlane.f32.xlu1 %v1187_v52 }
 0x456   : > { %v1047_v53 = vpop.permute.xlu2 %1046 }
 0x457   : > { %v1052_v54 = vpack.c.bf16 %v1047_v53, %v1047_v53 }
 0x458   : > { %1338 = vmatpush.bf16.msra.mxu3 %v1845_v51 }
 0x459   : > { %v1263_v55 = vsel %vm1204_vm7, %v1052_v54, 0  ;;  %v2062_v56 = vpop.eup %2061 }
 0x45a   : > { %1272 = vmatpush.bf16.msra.mxu2 %v1263_v55  ;;  %v1200_v57 = vpack.c.bf16 %v2062_v56, %v2062_v56  ;;  %v1190_v58 = vsel %vm1053_vm6, %v2062_v56, 0.0 }
 0x45b   : > { %v2064_v59 = vpop.eup %2063  ;;  %1191 = vadd.xlane.f32.xlu2 %v1190_v58 }
 0x45c   : > { %v1184_v60 = vsel %vm1053_vm6, %v2064_v59, 0.0  ;;  %v1198_v5 = vpack.c.bf16 %v2064_v59, %v2064_v59 }
 0x45d   : > { %1789 = vmatmul.msk.bf16.vlgmr.msra.gmra.mxu2 %vm1053_vm6, %v1200_v57  ;;  %1185 = vadd.xlane.f32.xlu0 %v1184_v60 }
 0x460   : > { %v1044_v61 = vpop.permute.xlu1 %1043 }
 0x461   : > { %v1051_v62 = vpack.c.bf16 %v1044_v61, %v1044_v61 }
 0x463   : > { %v1244_v63 = vsel %vm1204_vm7, %v1051_v62, 0  ;;  %v1041_v1 = vpop.permute.xlu0 %1040 }
 0x464   : > { %v1050_v2 = vpack.c.bf16 %v1041_v1, %v1041_v1  ;;  %1253 = vmatpush.bf16.msra.mxu1 %v1244_v63 }
 0x466   : > { %v1225_v4 = vsel %vm1204_vm7, %v1050_v2, 0 }
 0x467   : > { %1234 = vmatpush.bf16.msra.mxu0 %v1225_v4  ;;  %1788 = vmatmul.msk.bf16.vlgmr.msra.gmra.mxu1 %vm1053_vm6, %v1199_v3  ;;  %v2051_v4 = vld [vmem:[#allocation11] ss:$0 sm:$0xff] }
 0x468   : > { %1426 = vmatpush.bf16.msrb.mxu1 %v1850_v12 }
 0x46a   : > { %1787 = vmatmul.msk.bf16.vlgmr.msra.gmra.mxu0 %vm1053_vm6, %v1198_v5 }
 0x48f   : > { %v1143_v6 = vpop.xlane.xlu2 %1142 }
 0x490   : > { %v1165_v7 = vsub.f32 %v1137_v40, %v1143_v6  ;;  %v1153_v50 = vsub.f32 -inf, %v1143_v6 }
 0x492   : > { %v1169_v8 = vmul.f32 1.442695, %v1165_v7  ;;  %v1157_v52 = vmul.f32 1.442695, %v1153_v50 }
 0x494   : > { %2065 = vpow2.f32 %v1169_v8 }
 0x495   : > { %2067 = vpow2.f32 %v1163_v14  ;;  %v1849_v14 = vld [vmem:[#allocation22] sm:$0xff] }
 0x496   : > { %2069 = vpow2.f32 %v1161_v17  ;;  %1427 = vmatpush.bf16.msrb.mxu1 %v1849_v14 }
 0x497   : > { %2071 = vpow2.f32 %v1159_v18 }
 0x49a   : > { %v2066_v9 = vpop.eup %2065 }
 0x49b   : > { %v1181_v10 = vsel %vm1053_vm6, %v2066_v9, 0.0  ;;  %v1197_v11 = vpack.c.bf16 %v2066_v9, %v2066_v9  ;;  %v2068_v19 = vpop.eup %2067 }
 0x49c   : > { %1182 = vadd.xlane.f32.xlu0 %v1181_v10  ;;  %v1180_v21 = vmul.f32 0.0, %v2068_v19  ;;  %v2070_v22 = vpop.eup %2069 }
 0x49d   : > { %1786 = vmatmul.msk.bf16.vlgmr.msrb.gmra.mxu3 %vm1053_vm6, %v1197_v11  ;;  %v2072_v26 = vpop.eup %2071  ;;  %v1179_v27 = vmul.f32 0.0, %v2070_v22  ;;  %v1848_v11 = vld [vmem:[#allocation19 + $0x8] sm:$0xff] }
 0x49e   : > { %v1178_v30 = vmul.f32 0.0, %v2072_v26  ;;  %1393 = vmatpush.bf16.msrb.mxu0 %v1848_v11 }
 0x4a2   : > { %1394 = vmatpush.bf16.msrb.mxu0 %v1847_v13 }
 0x4c8   : > { %v1189_v24 = vpop.xlane.xlu1 %1188 }
 0x4c9   : > { %v1195_v28 = vadd.f32 %v1189_v24, %v1179_v27 }
 0x4ce   : > { %v1192_v20 = vpop.xlane.xlu2 %1191 }
 0x4cf   : > { %v1196_v23 = vadd.f32 %v1192_v20, %v1180_v21 }
 0x4d0   : > { %v1186_v29 = vpop.xlane.xlu0 %1185 }
 0x4d1   : > { %2073 = vrcp.f32 %v1196_v23  ;;  %v1194_v31 = vadd.f32 %v1186_v29, %v1178_v30  ;;  %v1853_v29 = vld [vmem:[%s3076_s18 + $0x10] sm:$0xff] }
 0x4d2   : > { %2075 = vrcp.f32 %v1195_v28 }
 0x4d3   : > { %2077 = vrcp.f32 %v1194_v31 }
 0x4d4   : > { %2079 = vpow2.f32 %v1157_v52 }
 0x4d7   : > { %v2074_v34 = vpop.eup %2073 }
 0x4d8   : > { %v2076_v38 = vpop.eup %2075 }
 0x4d9   : > { %v2078_v43 = vpop.eup %2077 }
 0x4da   : > { %v2080_v53 = vpop.eup %2079 }
 0x4db   : > { %v1177_v55 = vmul.f32 0.0, %v2080_v53 }
 0x4e0   : > { %v1274_v32 = vpop.f32.mrf.mxu2 }
 0x4e1   : > { %v1281_v33 = vadd.f32 %v1274_v32, %v1180_v21 }
 0x4e3   : > { %v1289_v35 = vmul.f32 %v2074_v34, %v1281_v33  ;;  %v1851_v34 = vld [vmem:[%s3076_s18] sm:$0xff] }
 0x4e4   : > { %v1255_v36 = vpop.f32.mrf.mxu1 }
 0x4e5   : > { %v1280_v37 = vadd.f32 %v1255_v36, %v1179_v27  ;;  %1299 = vrot.lane.b32.xlu1 %v1289_v35, %s2628_s27 }
 0x4e7   : > { %v1288_v39 = vmul.f32 %v2076_v38, %v1280_v37  ;;  %v1236_v40 = vpop.f32.mrf.mxu0 }
 0x4e8   : > { %v1279_v41 = vadd.f32 %v1236_v40, %v1178_v30  ;;  %v1276_v42 = vpop.f32.mrf.mxu2  ;;  %v2052_v30 = vld [vmem:[#allocation20] ss:$0 sm:$0xff] }
 0x4e9   : > { %1295 = vrot.lane.b32.xlu0 %v1288_v39, %s2629_s24 }
 0x4ea   : > { %v1287_v44 = vmul.f32 %v2078_v43, %v1279_v41 }
 0x4ec   : > { %v1257_v45 = vpop.f32.mrf.mxu1  ;;  %1291 = vrot.lane.b32.xlu2 %v1287_v44, %s2630_s0 }
 0x4ef   : > { %v1238_v46 = vpop.f32.mrf.mxu0 }
 0x50f   : > { %v1183_v54 = vpop.xlane.xlu0 %1182 }
 0x510   : > { %v1193_v56 = vadd.f32 %v1183_v54, %v1177_v55 }
 0x512   : > { %2081 = vrcp.f32 %v1193_v56 }
 0x518   : > { %v2082_v58 = vpop.eup %2081 }
 0x520   : > { %v1217_v47 = vpop.f32.mrf.mxu3 }
 0x521   : > { %v1278_v57 = vadd.f32 %v1217_v47, %v1177_v55  ;;  %v2053_v47 = vld [vmem:[#allocation23] ss:$0 sm:$0xff]  ;;  %v2054_v55 = vld [vmem:[%s3077_s19] ss:$0 sm:$0xff] }
 0x523   : > { %v1286_v60 = vmul.f32 %v2082_v58, %v1278_v57 }
 0x528   : > { %v1219_v48 = vpop.f32.mrf.mxu3 }
 0x546   : > { %v1292_v59 = vpop.permute.xlu2 %1291 }
 0x547   : > { %v1302_v61 = vsel %vm1053_vm6, %v1286_v60, %v1292_v59 }
 0x557   : > { %v1300_v63 = vpop.permute.xlu1 %1299 }
 0x55b   : > { %v1296_v62 = vpop.permute.xlu0 %1295 }
 0x55c   : > { %v1304_v1 = vsel %vm1303_vm9, %v1302_v61, %v1296_v62 }
 0x55d   : > { %v1306_v2 = vsel %vm1305_vm10, %v1304_v1, %v1300_v63 }
 0x55e   : > { %v1307_v3 = vpack.c.bf16 %v1306_v2, %v1306_v2 }
 0x560   : > { %1798 = vmatmul.msk.bf16.vlgmr.msra.gmra.mxu3 %vm841_vm0, %v1307_v3 }
 0x5e3   : > { %v1340_v5 = vpop.f32.mrf.mxu3 }
 0x5e4   : > { %v1341_v6 = vadd.f32 %v2051_v4, %v1340_v5 }
 0x5e6   : > { %v2999_v7 = vadd.f32 %v1341_v6, %v2918_v0 }
 0x5e8   : > { %v1345_v8 = vmul.f32 %v2999_v7, %v2999_v7 }
 0x5ea   : > { %v1346_v9 = vsel %vm841_vm0, %v1345_v8, 0.0 }
 0x5eb   : > { %v1342_v10 = vpop.f32.mrf.mxu3  ;;  %1347 = vadd.xlane.f32.xlu0 %v1346_v9 }
 0x65e   : > { %v1348_v16 = vpop.xlane.xlu0 %1347 }
 0x65f   : > { %v1349_v17 = vmul.f32 %v1348_v16, %v2935_v15  ;;  %v1854_v15 = vld [vmem:[%s3076_s18 + $0x18] sm:$0xff] }
 0x660   : > { %1499 = vmatpush.bf16.msrb.mxu2 %v1854_v15 }
 0x661   : > { %v1350_v0 = vadd.f32 1e-08, %v1349_v17 }
 0x663   : > { %2083 = vrsqrt.f32 %v1350_v0  ;;  %vm1357_vm12 = vweird.f32 %v1350_v0 }
 0x664   : > { %1500 = vmatpush.bf16.msrb.mxu2 %v1853_v29 }
 0x669   : > { %v2084_v18 = vpop.eup %2083 }
 0x66a   : > { %v1352_v19 = vmul.f32 %v2084_v18, %v1350_v0  ;;  %vm1358_vm11 = vweird.f32 %v2084_v18 }
 0x66b   : > { %vm1359_vm13 = vmor %vm1357_vm12, %vm1358_vm11 }
 0x66c   : > { %v1353_v20 = vmul.f32 %v2084_v18, %v1352_v19 }
 0x66e   : > { %v1354_v21 = vmul.f32 0.5, %v1353_v20 }
 0x670   : > { %v1355_v22 = vsub.f32 1.5, %v1354_v21 }
 0x672   : > { %v1356_v23 = vmul.f32 %v2084_v18, %v1355_v22 }
 0x674   : > { %v1360_v24 = vsel %vm1359_vm13, %v2084_v18, %v1356_v23 }
 0x675   : > { %v1361_v26 = vmul.f32 %v1360_v24, %v2999_v7 }
 0x677   : > { %v1362_v27 = vmul.f32 %v2938_v25, %v1361_v26  ;;  %v1852_v25 = vld [vmem:[%s3076_s18 + $0x8] sm:$0xff] }
 0x678   : > { %1501 = vmatpush.bf16.msrb.mxu2 %v1852_v25 }
 0x679   : > { %v1363_v28 = vpack.c.bf16 %v1362_v27, %v1362_v27 }
 0x67b   : > { %1807 = vmatmul.msk.bf16.vlgmr.msrb.gmra.mxu0 %vm841_vm0, %v1363_v28  ;;  %1816 = vmatmul.msk.bf16.vlgmr.msrb.gmra.mxu1 %vm841_vm0, %v1363_v28 }
 0x67c   : > { %1502 = vmatpush.bf16.msrb.mxu2 %v1851_v34 }
 0x6f8   : > { %v1396_v31 = vpop.f32.mrf.mxu0  ;;  %v1429_v32 = vpop.f32.mrf.mxu1 }
 0x6f9   : > { %v1397_v33 = vadd.f32 %v2052_v30, %v1396_v31  ;;  %v1430_v52 = vadd.f32 %v2053_v47, %v1429_v32 }
 0x6fb   : > { %v1817_v35 = vmul.f32 -1.442695, %v1397_v33 }
 0x6fd   : > { %2085 = vpow2.f32 %v1817_v35 }
 0x700   : > { %v1398_v36 = vpop.f32.mrf.mxu0  ;;  %v1431_v37 = vpop.f32.mrf.mxu1 }
 0x703   : > { %v2086_v38 = vpop.eup %2085 }
 0x704   : > { %v1436_v39 = vadd.f32 1.0, %v2086_v38 }
 0x706   : > { %2087 = vrcp.f32 %v1436_v39  ;;  %v1448_v43 = vand.u32 2147483648, %v1436_v39  ;;  %v1446_v45 = vand.u32 2147483647, %v1436_v39  ;;  %vm1442_vm15 = vweird.f32 %v1436_v39 }
 0x708   : > { %v1449_v48 = vor.u32 1.1754944e-38, %v1448_v43  ;;  %vm1447_vm2 = vcmp.eq.f32.partialorder %v1446_v45, 8.507059e+37 }
 0x70c   : > { %v2088_v40 = vpop.eup %2087 }
 0x70d   : > { %v1438_v41 = vmul.f32 %v2088_v40, %v1436_v39  ;;  %vm1443_vm14 = vweird.f32 %v2088_v40 }
 0x70e   : > { %vm1444_vm1 = vmor %vm1442_vm15, %vm1443_vm14 }
 0x70f   : > { %v1439_v42 = vsub.f32 1.0, %v1438_v41 }
 0x711   : > { %v1440_v44 = vmul.f32 %v2088_v40, %v1439_v42 }
 0x713   : > { %v1441_v46 = vadd.f32 %v2088_v40, %v1440_v44 }
 0x715   : > { %v1445_v49 = vsel %vm1444_vm1, %v2088_v40, %v1441_v46 }
 0x716   : > { %v1450_v50 = vsel %vm1447_vm2, %v1449_v48, %v1445_v49 }
 0x717   : > { %v1452_v51 = vmul.f32 %v1450_v50, %v1397_v33 }
 0x719   : > { %v1453_v53 = vmul.f32 %v1452_v51, %v1430_v52 }
 0x71b   : > { %v1454_v54 = vpack.c.bf16 %v1453_v53, %v1453_v53 }
 0x71d   : > { %1834 = vmatmul.msk.bf16.vlgmr.msrb.gmra.mxu2 %vm1491_vm3, %v1454_v54 }
 0x7a0   : > { %v1504_v56 = vpop.f32.mrf.mxu2 }
 0x7a1   : > { %v1505_v57 = vadd.f32 %v2054_v55, %v1504_v56 }
 0x7a3   : > { %v1508_v58 = vadd.f32 %v1505_v57, %v2999_v7 }
 0x7a5   : > { %1509 = vst.msk [vmem:[%s832_s1] sm:$0xff] %vm841_vm0, %v1508_v58 }
 0x7a6   : > { %2536 = shalt.err (!%p2533_p8)
}
 0x7a7   : > { %1911 = dma.vmem_to_hbm [thread:$0]  (%p2774_p5), %s1524_s29, 128, %s1526_s30, %s1511_s2  }
 0x7a8   : > { %v1506_v59 = vpop.f32.mrf.mxu2 }
 0x7a9 PF: > { %s3120_s28 = sld [smem:[#allocation37_spill]] }
 0x7aa   : > { %s3121_s24 = sld [smem:[#allocation35_spill]] }
 0x7af   : > { %p1988_p9 = scmp.ge.s32.totalorder %s3120_s28, 2 }
 0x7b0   : > { %s1537_s26 = sand.u32 1, %s3121_s24  }
 0x7b1   : > { %p1957_p10 = pnand %p1988_p9, %p2778_p6  ;;  %s1538_s1 = scalar_lea.sflag [#allocation4], %s1537_s26 }
 0x7b3   : > { %p1958_p11 = pneg %p1957_p10 }
 0x7b5   : > { %2586 = dma.done.wait (%p1958_p11), %s1538_s1, 128  }
 0x7b6   : > { %2588 = vsyncadd (%p1958_p11), %s1538_s1, 4294967168  ;;  %s3123_s24 = sld [smem:[#allocation38_spill]]  ;;  %s3126_s1 = smov %s2595_s22 }
 0x7b7   : > { %s3124_s5 = sld [smem:[#allocation36_spill]] }
 0x7b8   : > { %s3125_s23 = sld [smem:[#allocation39_spill]] }
 0x7bc   : > { %p38_p12 = scmp.ge.s32.totalorder %s3123_s24, 4  }
 0x7bd   : > { %s3127_s22 = smov %s3124_s5 }
 0x7be   :  { %40 = sbr.rel (!%p38_p12) target bundleno = 21 (0x15), region = 192 }
 0x7c3   :  { %1544 = vsyncpa [#allocation3], 1 }
 0x7c4   :  { %1546 = vsyncpa [#allocation3 + $0x1], 1 }
 0x7c5   :  { %1547 = vsyncpa [#allocation6], 1 }
 0x7c6   :  { %1548 = vsyncpa [#allocation9], 1 }
 0x7c7   :  { %1549 = vsyncpa [#allocation12], 1 }
 0x7c8   :  { %1550 = vsyncpa [#allocation15], 1 }
 0x7c9   :  { %1551 = vsyncpa [#allocation18], 1 }
 0x7ca   :  { %1552 = vsyncpa [#allocation21], 1 }
 0x7cb   :  { %1553 = vsyncpa [#allocation24], 1 }
 0x7cc   :  { %1554 = vsyncpa [#allocation4], 1 }
 0x7cd   :  { %1556 = vsyncpa [#allocation4 + $0x1], 1 }

</bundles_post_ra>
